<compile_context>
chip_gen: v7x
topology: tpu7x:2x2x1
jax: 0.10.0
libtpu: 0.0.40
codegen_flags: <defaults>
</compile_context>

<pallas_src>
import functools
import math

import jax
import jax.numpy as jnp
from jax import lax
from jax.experimental import pallas as pl
from jax.experimental.pallas import tpu as pltpu


# ----------------------------------------------------------------------------
# Fused encoder-layer kernel (QKV proj + MHA + out proj + LN + FFN + LN)
# ----------------------------------------------------------------------------
def _layer_norm(y, gamma, beta, eps=1e-5):
    mean = jnp.mean(y, axis=-1, keepdims=True)
    yc = y - mean
    var = jnp.mean(yc * yc, axis=-1, keepdims=True)
    return yc * lax.rsqrt(var + eps) * gamma + beta


def _encoder_layer_kernel(
    x_ref, mask_ref,
    wqkv_ref, bqkv_ref, wo_ref, bo_ref,
    ln1_g_ref, ln1_b_ref,
    w1_ref, b1_ref, w2_ref, b2_ref,
    ln2_g_ref, ln2_b_ref,
    o_ref,
    attn_scr,
    *, num_heads,
):
    # x_ref block: (1, S, D) for one batch element
    x = x_ref[0]                                    # [S, D] f32
    S, D = x.shape
    hd = D // num_heads
    scale = 1.0 / math.sqrt(hd)
    mask = mask_ref[...]                            # [S, S] additive f32

    # --- fused QKV projection: one [S, D] x [D, 3D] matmul (bf16 MXU, f32 acc)
    qkv = jnp.dot(x.astype(jnp.bfloat16), wqkv_ref[...],
                  preferred_element_type=jnp.float32) + bqkv_ref[...]

    # --- per-head attention; heads are contiguous column slices of qkv, the
    #     per-head outputs are assembled in a VMEM scratch (never go to HBM).
    for h in range(num_heads):
        q = qkv[:, h * hd:(h + 1) * hd]
        k = qkv[:, D + h * hd:D + (h + 1) * hd]
        v = qkv[:, 2 * D + h * hd:2 * D + (h + 1) * hd]
        # contract last axes directly (no materialized k.T)
        s = lax.dot_general(
            q.astype(jnp.bfloat16), k.astype(jnp.bfloat16),
            (((1,), (1,)), ((), ())),
            preferred_element_type=jnp.float32) * scale + mask
        m = jnp.max(s, axis=-1, keepdims=True)
        p = jnp.exp(s - m)
        p = p * pl.reciprocal(jnp.sum(p, axis=-1, keepdims=True), approx=True)
        attn_scr[:, h * hd:(h + 1) * hd] = jnp.dot(
            p.astype(jnp.bfloat16), v.astype(jnp.bfloat16),
            preferred_element_type=jnp.float32)

    # --- output projection + residual + LayerNorm 1 (fused epilogue)
    attn = jnp.dot(attn_scr[...].astype(jnp.bfloat16), wo_ref[...],
                   preferred_element_type=jnp.float32) + bo_ref[...]
    y1 = _layer_norm(x + attn, ln1_g_ref[...], ln1_b_ref[...])

    # --- fused FFN (hidden activation stays in VMEM/vregs) + residual + LN 2
    h1 = jnp.maximum(
        jnp.dot(y1.astype(jnp.bfloat16), w1_ref[...],
                preferred_element_type=jnp.float32) + b1_ref[...],
        0.0)
    ff = jnp.dot(h1.astype(jnp.bfloat16), w2_ref[...],
                 preferred_element_type=jnp.float32) + b2_ref[...]
    o_ref[0] = _layer_norm(y1 + ff, ln2_g_ref[...], ln2_b_ref[...])


# ----------------------------------------------------------------------------
# Wrapper: one pallas_call per layer, grid over batch, weights resident.
# ----------------------------------------------------------------------------
def encoder_layer_forward(x, mask, p, num_heads):
    B, S, D = x.shape
    FF = p["w1"].shape[1]
    kernel = functools.partial(_encoder_layer_kernel, num_heads=num_heads)

    # Weight / bias / LN specs are block-index invariant -> DMA'd once and
    # kept resident in VMEM across the (parallel) batch grid.
    const = lambda b: (0, 0)
    return pl.pallas_call(
        kernel,
        out_shape=jax.ShapeDtypeStruct((B, S, D), jnp.float32),
        grid=(B,),
        in_specs=[
            pl.BlockSpec((1, S, D), lambda b: (b, 0, 0)),   # x
            pl.BlockSpec((S, S), const),                    # additive mask
            pl.BlockSpec((D, 3 * D), const),                # wqkv (bf16)
            pl.BlockSpec((1, 3 * D), const),                # bqkv
            pl.BlockSpec((D, D), const),                    # wo   (bf16)
            pl.BlockSpec((1, D), const),                    # bo
            pl.BlockSpec((1, D), const),                    # ln1 gamma
            pl.BlockSpec((1, D), const),                    # ln1 beta
            pl.BlockSpec((D, FF), const),                   # w1   (bf16)
            pl.BlockSpec((1, FF), const),                   # b1
            pl.BlockSpec((FF, D), const),                   # w2   (bf16)
            pl.BlockSpec((1, D), const),                    # b2
            pl.BlockSpec((1, D), const),                    # ln2 gamma
            pl.BlockSpec((1, D), const),                    # ln2 beta
        ],
        out_specs=pl.BlockSpec((1, S, D), lambda b: (b, 0, 0)),
        scratch_shapes=[pltpu.VMEM((S, D), jnp.float32)],   # attention output
        compiler_params=pltpu.CompilerParams(
            dimension_semantics=("parallel",)),
    )(x, mask, p["wqkv"], p["bqkv"], p["wo"], p["bo"],
      p["ln1_g"], p["ln1_b"], p["w1"], p["b1"], p["w2"], p["b2"],
      p["ln2_g"], p["ln2_b"])


def proposed_encoder_forward(x, mask, layer_params, num_heads):
    # Mirrors ProposedEncoder.forward: sequentially apply each layer(x, mask).
    # TODO(synk): for large B*S / D / FF this single-block-per-batch layout
    # would need a real (M, N, K) tiling; at the module's small sizes the
    # whole layer fits comfortably in VMEM (even on v7x's 64 MiB).
    for p in layer_params:
        x = encoder_layer_forward(x, mask, p, num_heads)
    return x


# ----------------------------------------------------------------------------
# Deterministic parameter init (xavier-uniform-style); matmul weights in bf16,
# biases / LN params in f32 (epilogues stay f32 on the VPU).
# ----------------------------------------------------------------------------
def xavier(key, fan_in, fan_out):
    limit = math.sqrt(6.0 / (fan_in + fan_out))
    return jax.random.uniform(key, (fan_in, fan_out), jnp.float32, -limit, limit)


def make_layer_params(key, d_model, dim_ff):
    ks = jax.random.split(key, 6)
    wq = xavier(ks[0], d_model, d_model)
    wk = xavier(ks[1], d_model, d_model)
    wv = xavier(ks[2], d_model, d_model)
    return {
        "wqkv": jnp.concatenate([wq, wk, wv], axis=1).astype(jnp.bfloat16),
        "bqkv": jnp.zeros((1, 3 * d_model), jnp.float32),
        "wo": xavier(ks[3], d_model, d_model).astype(jnp.bfloat16),
        "bo": jnp.zeros((1, d_model), jnp.float32),
        "w1": xavier(ks[4], d_model, dim_ff).astype(jnp.bfloat16),
        "b1": jnp.zeros((1, dim_ff), jnp.float32),
        "w2": xavier(ks[5], dim_ff, d_model).astype(jnp.bfloat16),
        "b2": jnp.zeros((1, d_model), jnp.float32),
        "ln1_g": jnp.ones((1, d_model), jnp.float32),
        "ln1_b": jnp.zeros((1, d_model), jnp.float32),
        "ln2_g": jnp.ones((1, d_model), jnp.float32),
        "ln2_b": jnp.zeros((1, d_model), jnp.float32),
    }


# ----------------------------------------------------------------------------
if __name__ == "__main__":
    B, S, D, H, FF, L = 2, 8, 32, 4, 64, 2

    key = jax.random.PRNGKey(0)
    kx, *kl = jax.random.split(key, L + 1)

    x = jax.random.normal(kx, (B, S, D), jnp.float32)

    # Additive causal attention mask (0 where attended, -1e9 where masked),
    # matching the semantics of a float attn_mask added to the scores.
    causal = jnp.tril(jnp.ones((S, S), jnp.bool_))
    mask = jnp.where(causal, 0.0, -1e9).astype(jnp.float32)

    layer_params = [make_layer_params(kl[i], D, FF) for i in range(L)]

    # TODO(synk): src_key_padding_mask is accepted but unused by
    # ProposedEncoder.forward, so it is intentionally not implemented;
    # dropout is omitted (inference / p=0).
    fwd = jax.jit(functools.partial(proposed_encoder_forward, num_heads=H))
    out = fwd(x, mask, layer_params)
    out = jax.block_until_ready(out)
    assert out.shape == (B, S, D)
    print("KERNEL_OK")
</pallas_src>

<mosaic_0001>
module attributes {stable_mosaic.version = 11 : i64} {
  func.func @_encoder_layer_kernel(%arg0: i32, %arg1: memref<1x8x32xf32, #tpu.memory_space<vmem>>, %arg2: memref<8x8xf32, #tpu.memory_space<vmem>>, %arg3: memref<32x96xbf16, #tpu.memory_space<vmem>>, %arg4: memref<1x96xf32, #tpu.memory_space<vmem>>, %arg5: memref<32x32xbf16, #tpu.memory_space<vmem>>, %arg6: memref<1x32xf32, #tpu.memory_space<vmem>>, %arg7: memref<1x32xf32, #tpu.memory_space<vmem>>, %arg8: memref<1x32xf32, #tpu.memory_space<vmem>>, %arg9: memref<32x64xbf16, #tpu.memory_space<vmem>>, %arg10: memref<1x64xf32, #tpu.memory_space<vmem>>, %arg11: memref<64x32xbf16, #tpu.memory_space<vmem>>, %arg12: memref<1x32xf32, #tpu.memory_space<vmem>>, %arg13: memref<1x32xf32, #tpu.memory_space<vmem>>, %arg14: memref<1x32xf32, #tpu.memory_space<vmem>>, %arg15: memref<1x8x32xf32, #tpu.memory_space<vmem>>, %arg16: memref<8x32xf32, #tpu.memory_space<vmem>>) attributes {dimension_semantics = [#tpu.dimension_semantics<parallel>], iteration_bounds = array<i64: 2>, scalar_prefetch = 0 : i64, scratch_operands = 1 : i64, tpu.core_type = #tpu.core_type<tc>, window_params = [{transform_indices = @transform_0, window_bounds = array<i64: 1, 8, 32>}, {pipeline_mode = #tpu.pipeline_mode<synchronous>, transform_indices = @transform_1, window_bounds = array<i64: 8, 8>}, {pipeline_mode = #tpu.pipeline_mode<synchronous>, transform_indices = @transform_2, window_bounds = array<i64: 32, 96>}, {pipeline_mode = #tpu.pipeline_mode<synchronous>, transform_indices = @transform_3, window_bounds = array<i64: 1, 96>}, {pipeline_mode = #tpu.pipeline_mode<synchronous>, transform_indices = @transform_4, window_bounds = array<i64: 32, 32>}, {pipeline_mode = #tpu.pipeline_mode<synchronous>, transform_indices = @transform_5, window_bounds = array<i64: 1, 32>}, {pipeline_mode = #tpu.pipeline_mode<synchronous>, transform_indices = @transform_6, window_bounds = array<i64: 1, 32>}, {pipeline_mode = #tpu.pipeline_mode<synchronous>, transform_indices = @transform_7, window_bounds = array<i64: 1, 32>}, {pipeline_mode = #tpu.pipeline_mode<synchronous>, transform_indices = @transform_8, window_bounds = array<i64: 32, 64>}, {pipeline_mode = #tpu.pipeline_mode<synchronous>, transform_indices = @transform_9, window_bounds = array<i64: 1, 64>}, {pipeline_mode = #tpu.pipeline_mode<synchronous>, transform_indices = @transform_10, window_bounds = array<i64: 64, 32>}, {pipeline_mode = #tpu.pipeline_mode<synchronous>, transform_indices = @transform_11, window_bounds = array<i64: 1, 32>}, {pipeline_mode = #tpu.pipeline_mode<synchronous>, transform_indices = @transform_12, window_bounds = array<i64: 1, 32>}, {pipeline_mode = #tpu.pipeline_mode<synchronous>, transform_indices = @transform_13, window_bounds = array<i64: 1, 32>}, {transform_indices = @transform_14, window_bounds = array<i64: 1, 8, 32>}]} {
    %c0 = arith.constant 0 : index
    %c0_0 = arith.constant 0 : index
    %c0_1 = arith.constant 0 : index
    %0 = vector.load %arg1[%c0, %c0_0, %c0_1] : memref<1x8x32xf32, #tpu.memory_space<vmem>>, vector<1x8x32xf32>
    %1 = vector.shape_cast %0 : vector<1x8x32xf32> to vector<8x32xf32>
    %c0_2 = arith.constant 0 : index
    %c0_3 = arith.constant 0 : index
    %2 = vector.load %arg2[%c0_2, %c0_3] : memref<8x8xf32, #tpu.memory_space<vmem>>, vector<8x8xf32>
    %3 = arith.truncf %1 : vector<8x32xf32> to vector<8x32xbf16>
    %c0_4 = arith.constant 0 : index
    %c0_5 = arith.constant 0 : index
    %4 = vector.load %arg3[%c0_4, %c0_5] : memref<32x96xbf16, #tpu.memory_space<vmem>>, vector<32x96xbf16>
    %cst = arith.constant dense<0.000000e+00> : vector<8x96xf32>
    %5 = tpu.matmul %3, %4, %cst {dimension_numbers = #tpu.dot_dimension_numbers<[1], [0], [0], [1], [0, 0, 1, 1], [], []>} : vector<8x32xbf16>, vector<32x96xbf16>, vector<8x96xf32> -> vector<8x96xf32>
    %c0_6 = arith.constant 0 : index
    %c0_7 = arith.constant 0 : index
    %6 = vector.load %arg4[%c0_6, %c0_7] : memref<1x96xf32, #tpu.memory_space<vmem>>, vector<1x96xf32>
    %7 = vector.broadcast %6 : vector<1x96xf32> to vector<8x96xf32>
    %8 = arith.addf %5, %7 : vector<8x96xf32>
    %9 = vector.extract_strided_slice %8 {offsets = [0, 0], sizes = [8, 8], strides = [1, 1]} : vector<8x96xf32> to vector<8x8xf32>
    %10 = vector.extract_strided_slice %8 {offsets = [0, 32], sizes = [8, 8], strides = [1, 1]} : vector<8x96xf32> to vector<8x8xf32>
    %11 = vector.extract_strided_slice %8 {offsets = [0, 64], sizes = [8, 8], strides = [1, 1]} : vector<8x96xf32> to vector<8x8xf32>
    %12 = arith.truncf %9 : vector<8x8xf32> to vector<8x8xbf16>
    %13 = arith.truncf %10 : vector<8x8xf32> to vector<8x8xbf16>
    %cst_8 = arith.constant dense<0.000000e+00> : vector<8x8xf32>
    %14 = tpu.matmul %12, %13, %cst_8 {dimension_numbers = #tpu.dot_dimension_numbers<[1], [1], [0], [0], [0, 0, 1, 0], [], []>} : vector<8x8xbf16>, vector<8x8xbf16>, vector<8x8xf32> -> vector<8x8xf32>
    %cst_9 = arith.constant 0.353553385 : f32
    %15 = vector.broadcast %cst_9 : f32 to vector<8x8xf32>
    %16 = arith.mulf %14, %15 : vector<8x8xf32>
    %17 = arith.addf %16, %2 : vector<8x8xf32>
    %cst_10 = arith.constant dense<0xFF800000> : vector<8xf32>
    %18 = vector.multi_reduction <maximumf>, %17, %cst_10 [1] : vector<8x8xf32> to vector<8xf32>
    %19 = vector.shape_cast %18 : vector<8xf32> to vector<8x1xf32>
    %20 = vector.broadcast %19 : vector<8x1xf32> to vector<8x8xf32>
    %21 = arith.subf %17, %20 : vector<8x8xf32>
    %22 = math.exp %21 : vector<8x8xf32>
    %cst_11 = arith.constant dense<0.000000e+00> : vector<8xf32>
    %23 = vector.multi_reduction <add>, %22, %cst_11 [1] : vector<8x8xf32> to vector<8xf32>
    %24 = vector.shape_cast %23 : vector<8xf32> to vector<8x1xf32>
    %25 = tpu.reciprocal %24 {approx = true} : vector<8x1xf32> -> vector<8x1xf32>
    %26 = vector.broadcast %25 : vector<8x1xf32> to vector<8x8xf32>
    %27 = arith.mulf %22, %26 : vector<8x8xf32>
    %28 = arith.truncf %27 : vector<8x8xf32> to vector<8x8xbf16>
    %29 = arith.truncf %11 : vector<8x8xf32> to vector<8x8xbf16>
    %cst_12 = arith.constant dense<0.000000e+00> : vector<8x8xf32>
    %30 = tpu.matmul %28, %29, %cst_12 {dimension_numbers = #tpu.dot_dimension_numbers<[1], [0], [0], [1], [0, 0, 1, 1], [], []>} : vector<8x8xbf16>, vector<8x8xbf16>, vector<8x8xf32> -> vector<8x8xf32>
    %c0_13 = arith.constant 0 : index
    %c0_14 = arith.constant 0 : index
    %31 = vector.load %arg16[%c0_13, %c0_14] : memref<8x32xf32, #tpu.memory_space<vmem>>, vector<8x8xf32>
    tpu.vector_store %arg16[%c0_13, %c0_14], %30 {strides = array<i32>} : memref<8x32xf32, #tpu.memory_space<vmem>>, vector<8x8xf32>,
    %32 = vector.extract_strided_slice %8 {offsets = [0, 8], sizes = [8, 8], strides = [1, 1]} : vector<8x96xf32> to vector<8x8xf32>
    %33 = vector.extract_strided_slice %8 {offsets = [0, 40], sizes = [8, 8], strides = [1, 1]} : vector<8x96xf32> to vector<8x8xf32>
    %34 = vector.extract_strided_slice %8 {offsets = [0, 72], sizes = [8, 8], strides = [1, 1]} : vector<8x96xf32> to vector<8x8xf32>
    %35 = arith.truncf %32 : vector<8x8xf32> to vector<8x8xbf16>
    %36 = arith.truncf %33 : vector<8x8xf32> to vector<8x8xbf16>
    %cst_15 = arith.constant dense<0.000000e+00> : vector<8x8xf32>
    %37 = tpu.matmul %35, %36, %cst_15 {dimension_numbers = #tpu.dot_dimension_numbers<[1], [1], [0], [0], [0, 0, 1, 0], [], []>} : vector<8x8xbf16>, vector<8x8xbf16>, vector<8x8xf32> -> vector<8x8xf32>
    %cst_16 = arith.constant 0.353553385 : f32
    %38 = vector.broadcast %cst_16 : f32 to vector<8x8xf32>
    %39 = arith.mulf %37, %38 : vector<8x8xf32>
    %40 = arith.addf %39, %2 : vector<8x8xf32>
    %cst_17 = arith.constant dense<0xFF800000> : vector<8xf32>
    %41 = vector.multi_reduction <maximumf>, %40, %cst_17 [1] : vector<8x8xf32> to vector<8xf32>
    %42 = vector.shape_cast %41 : vector<8xf32> to vector<8x1xf32>
    %43 = vector.broadcast %42 : vector<8x1xf32> to vector<8x8xf32>
    %44 = arith.subf %40, %43 : vector<8x8xf32>
    %45 = math.exp %44 : vector<8x8xf32>
    %cst_18 = arith.constant dense<0.000000e+00> : vector<8xf32>
    %46 = vector.multi_reduction <add>, %45, %cst_18 [1] : vector<8x8xf32> to vector<8xf32>
    %47 = vector.shape_cast %46 : vector<8xf32> to vector<8x1xf32>
    %48 = tpu.reciprocal %47 {approx = true} : vector<8x1xf32> -> vector<8x1xf32>
    %49 = vector.broadcast %48 : vector<8x1xf32> to vector<8x8xf32>
    %50 = arith.mulf %45, %49 : vector<8x8xf32>
    %51 = arith.truncf %50 : vector<8x8xf32> to vector<8x8xbf16>
    %52 = arith.truncf %34 : vector<8x8xf32> to vector<8x8xbf16>
    %cst_19 = arith.constant dense<0.000000e+00> : vector<8x8xf32>
    %53 = tpu.matmul %51, %52, %cst_19 {dimension_numbers = #tpu.dot_dimension_numbers<[1], [0], [0], [1], [0, 0, 1, 1], [], []>} : vector<8x8xbf16>, vector<8x8xbf16>, vector<8x8xf32> -> vector<8x8xf32>
    %c0_20 = arith.constant 0 : index
    %c8 = arith.constant 8 : index
    %54 = vector.load %arg16[%c0_20, %c8] : memref<8x32xf32, #tpu.memory_space<vmem>>, vector<8x8xf32>
    tpu.vector_store %arg16[%c0_20, %c8], %53 {strides = array<i32>} : memref<8x32xf32, #tpu.memory_space<vmem>>, vector<8x8xf32>,
    %55 = vector.extract_strided_slice %8 {offsets = [0, 16], sizes = [8, 8], strides = [1, 1]} : vector<8x96xf32> to vector<8x8xf32>
    %56 = vector.extract_strided_slice %8 {offsets = [0, 48], sizes = [8, 8], strides = [1, 1]} : vector<8x96xf32> to vector<8x8xf32>
    %57 = vector.extract_strided_slice %8 {offsets = [0, 80], sizes = [8, 8], strides = [1, 1]} : vector<8x96xf32> to vector<8x8xf32>
    %58 = arith.truncf %55 : vector<8x8xf32> to vector<8x8xbf16>
    %59 = arith.truncf %56 : vector<8x8xf32> to vector<8x8xbf16>
    %cst_21 = arith.constant dense<0.000000e+00> : vector<8x8xf32>
    %60 = tpu.matmul %58, %59, %cst_21 {dimension_numbers = #tpu.dot_dimension_numbers<[1], [1], [0], [0], [0, 0, 1, 0], [], []>} : vector<8x8xbf16>, vector<8x8xbf16>, vector<8x8xf32> -> vector<8x8xf32>
    %cst_22 = arith.constant 0.353553385 : f32
    %61 = vector.broadcast %cst_22 : f32 to vector<8x8xf32>
    %62 = arith.mulf %60, %61 : vector<8x8xf32>
    %63 = arith.addf %62, %2 : vector<8x8xf32>
    %cst_23 = arith.constant dense<0xFF800000> : vector<8xf32>
    %64 = vector.multi_reduction <maximumf>, %63, %cst_23 [1] : vector<8x8xf32> to vector<8xf32>
    %65 = vector.shape_cast %64 : vector<8xf32> to vector<8x1xf32>
    %66 = vector.broadcast %65 : vector<8x1xf32> to vector<8x8xf32>
    %67 = arith.subf %63, %66 : vector<8x8xf32>
    %68 = math.exp %67 : vector<8x8xf32>
    %cst_24 = arith.constant dense<0.000000e+00> : vector<8xf32>
    %69 = vector.multi_reduction <add>, %68, %cst_24 [1] : vector<8x8xf32> to vector<8xf32>
    %70 = vector.shape_cast %69 : vector<8xf32> to vector<8x1xf32>
    %71 = tpu.reciprocal %70 {approx = true} : vector<8x1xf32> -> vector<8x1xf32>
    %72 = vector.broadcast %71 : vector<8x1xf32> to vector<8x8xf32>
    %73 = arith.mulf %68, %72 : vector<8x8xf32>
    %74 = arith.truncf %73 : vector<8x8xf32> to vector<8x8xbf16>
    %75 = arith.truncf %57 : vector<8x8xf32> to vector<8x8xbf16>
    %cst_25 = arith.constant dense<0.000000e+00> : vector<8x8xf32>
    %76 = tpu.matmul %74, %75, %cst_25 {dimension_numbers = #tpu.dot_dimension_numbers<[1], [0], [0], [1], [0, 0, 1, 1], [], []>} : vector<8x8xbf16>, vector<8x8xbf16>, vector<8x8xf32> -> vector<8x8xf32>
    %c0_26 = arith.constant 0 : index
    %c16 = arith.constant 16 : index
    %77 = vector.load %arg16[%c0_26, %c16] : memref<8x32xf32, #tpu.memory_space<vmem>>, vector<8x8xf32>
    tpu.vector_store %arg16[%c0_26, %c16], %76 {strides = array<i32>} : memref<8x32xf32, #tpu.memory_space<vmem>>, vector<8x8xf32>,
    %78 = vector.extract_strided_slice %8 {offsets = [0, 24], sizes = [8, 8], strides = [1, 1]} : vector<8x96xf32> to vector<8x8xf32>
    %79 = vector.extract_strided_slice %8 {offsets = [0, 56], sizes = [8, 8], strides = [1, 1]} : vector<8x96xf32> to vector<8x8xf32>
    %80 = vector.extract_strided_slice %8 {offsets = [0, 88], sizes = [8, 8], strides = [1, 1]} : vector<8x96xf32> to vector<8x8xf32>
    %81 = arith.truncf %78 : vector<8x8xf32> to vector<8x8xbf16>
    %82 = arith.truncf %79 : vector<8x8xf32> to vector<8x8xbf16>
    %cst_27 = arith.constant dense<0.000000e+00> : vector<8x8xf32>
    %83 = tpu.matmul %81, %82, %cst_27 {dimension_numbers = #tpu.dot_dimension_numbers<[1], [1], [0], [0], [0, 0, 1, 0], [], []>} : vector<8x8xbf16>, vector<8x8xbf16>, vector<8x8xf32> -> vector<8x8xf32>
    %cst_28 = arith.constant 0.353553385 : f32
    %84 = vector.broadcast %cst_28 : f32 to vector<8x8xf32>
    %85 = arith.mulf %83, %84 : vector<8x8xf32>
    %86 = arith.addf %85, %2 : vector<8x8xf32>
    %cst_29 = arith.constant dense<0xFF800000> : vector<8xf32>
    %87 = vector.multi_reduction <maximumf>, %86, %cst_29 [1] : vector<8x8xf32> to vector<8xf32>
    %88 = vector.shape_cast %87 : vector<8xf32> to vector<8x1xf32>
    %89 = vector.broadcast %88 : vector<8x1xf32> to vector<8x8xf32>
    %90 = arith.subf %86, %89 : vector<8x8xf32>
    %91 = math.exp %90 : vector<8x8xf32>
    %cst_30 = arith.constant dense<0.000000e+00> : vector<8xf32>
    %92 = vector.multi_reduction <add>, %91, %cst_30 [1] : vector<8x8xf32> to vector<8xf32>
    %93 = vector.shape_cast %92 : vector<8xf32> to vector<8x1xf32>
    %94 = tpu.reciprocal %93 {approx = true} : vector<8x1xf32> -> vector<8x1xf32>
    %95 = vector.broadcast %94 : vector<8x1xf32> to vector<8x8xf32>
    %96 = arith.mulf %91, %95 : vector<8x8xf32>
    %97 = arith.truncf %96 : vector<8x8xf32> to vector<8x8xbf16>
    %98 = arith.truncf %80 : vector<8x8xf32> to vector<8x8xbf16>
    %cst_31 = arith.constant dense<0.000000e+00> : vector<8x8xf32>
    %99 = tpu.matmul %97, %98, %cst_31 {dimension_numbers = #tpu.dot_dimension_numbers<[1], [0], [0], [1], [0, 0, 1, 1], [], []>} : vector<8x8xbf16>, vector<8x8xbf16>, vector<8x8xf32> -> vector<8x8xf32>
    %c0_32 = arith.constant 0 : index
    %c24 = arith.constant 24 : index
    %100 = vector.load %arg16[%c0_32, %c24] : memref<8x32xf32, #tpu.memory_space<vmem>>, vector<8x8xf32>
    tpu.vector_store %arg16[%c0_32, %c24], %99 {strides = array<i32>} : memref<8x32xf32, #tpu.memory_space<vmem>>, vector<8x8xf32>,
    %c0_33 = arith.constant 0 : index
    %c0_34 = arith.constant 0 : index
    %101 = vector.load %arg16[%c0_33, %c0_34] : memref<8x32xf32, #tpu.memory_space<vmem>>, vector<8x32xf32>
    %102 = arith.truncf %101 : vector<8x32xf32> to vector<8x32xbf16>
    %c0_35 = arith.constant 0 : index
    %c0_36 = arith.constant 0 : index
    %103 = vector.load %arg5[%c0_35, %c0_36] : memref<32x32xbf16, #tpu.memory_space<vmem>>, vector<32x32xbf16>
    %cst_37 = arith.constant dense<0.000000e+00> : vector<8x32xf32>
    %104 = tpu.matmul %102, %103, %cst_37 {dimension_numbers = #tpu.dot_dimension_numbers<[1], [0], [0], [1], [0, 0, 1, 1], [], []>} : vector<8x32xbf16>, vector<32x32xbf16>, vector<8x32xf32> -> vector<8x32xf32>
    %c0_38 = arith.constant 0 : index
    %c0_39 = arith.constant 0 : index
    %105 = vector.load %arg6[%c0_38, %c0_39] : memref<1x32xf32, #tpu.memory_space<vmem>>, vector<1x32xf32>
    %106 = vector.broadcast %105 : vector<1x32xf32> to vector<8x32xf32>
    %107 = arith.addf %104, %106 : vector<8x32xf32>
    %108 = arith.addf %1, %107 : vector<8x32xf32>
    %c0_40 = arith.constant 0 : index
    %c0_41 = arith.constant 0 : index
    %109 = vector.load %arg7[%c0_40, %c0_41] : memref<1x32xf32, #tpu.memory_space<vmem>>, vector<1x32xf32>
    %c0_42 = arith.constant 0 : index
    %c0_43 = arith.constant 0 : index
    %110 = vector.load %arg8[%c0_42, %c0_43] : memref<1x32xf32, #tpu.memory_space<vmem>>, vector<1x32xf32>
    %cst_44 = arith.constant dense<0.000000e+00> : vector<8xf32>
    %111 = vector.multi_reduction <add>, %108, %cst_44 [1] : vector<8x32xf32> to vector<8xf32>
    %112 = vector.shape_cast %111 : vector<8xf32> to vector<8x1xf32>
    %cst_45 = arith.constant 3.200000e+01 : f32
    %113 = vector.broadcast %cst_45 : f32 to vector<8x1xf32>
    %114 = arith.divf %112, %113 : vector<8x1xf32>
    %115 = vector.broadcast %114 : vector<8x1xf32> to vector<8x32xf32>
    %116 = arith.subf %108, %115 : vector<8x32xf32>
    %117 = arith.mulf %116, %116 : vector<8x32xf32>
    %cst_46 = arith.constant dense<0.000000e+00> : vector<8xf32>
    %118 = vector.multi_reduction <add>, %117, %cst_46 [1] : vector<8x32xf32> to vector<8xf32>
    %119 = vector.shape_cast %118 : vector<8xf32> to vector<8x1xf32>
    %cst_47 = arith.constant 3.200000e+01 : f32
    %120 = vector.broadcast %cst_47 : f32 to vector<8x1xf32>
    %121 = arith.divf %119, %120 : vector<8x1xf32>
    %cst_48 = arith.constant 9.99999974E-6 : f32
    %122 = vector.broadcast %cst_48 : f32 to vector<8x1xf32>
    %123 = arith.addf %121, %122 : vector<8x1xf32>
    %124 = math.rsqrt %123 : vector<8x1xf32>
    %125 = vector.broadcast %124 : vector<8x1xf32> to vector<8x32xf32>
    %126 = arith.mulf %116, %125 : vector<8x32xf32>
    %127 = vector.broadcast %109 : vector<1x32xf32> to vector<8x32xf32>
    %128 = arith.mulf %126, %127 : vector<8x32xf32>
    %129 = vector.broadcast %110 : vector<1x32xf32> to vector<8x32xf32>
    %130 = arith.addf %128, %129 : vector<8x32xf32>
    %131 = arith.truncf %130 : vector<8x32xf32> to vector<8x32xbf16>
    %c0_49 = arith.constant 0 : index
    %c0_50 = arith.constant 0 : index
    %132 = vector.load %arg9[%c0_49, %c0_50] : memref<32x64xbf16, #tpu.memory_space<vmem>>, vector<32x64xbf16>
    %cst_51 = arith.constant dense<0.000000e+00> : vector<8x64xf32>
    %133 = tpu.matmul %131, %132, %cst_51 {dimension_numbers = #tpu.dot_dimension_numbers<[1], [0], [0], [1], [0, 0, 1, 1], [], []>} : vector<8x32xbf16>, vector<32x64xbf16>, vector<8x64xf32> -> vector<8x64xf32>
    %c0_52 = arith.constant 0 : index
    %c0_53 = arith.constant 0 : index
    %134 = vector.load %arg10[%c0_52, %c0_53] : memref<1x64xf32, #tpu.memory_space<vmem>>, vector<1x64xf32>
    %135 = vector.broadcast %134 : vector<1x64xf32> to vector<8x64xf32>
    %136 = arith.addf %133, %135 : vector<8x64xf32>
    %cst_54 = arith.constant 0.000000e+00 : f32
    %137 = vector.broadcast %cst_54 : f32 to vector<8x64xf32>
    %138 = arith.maximumf %136, %137 : vector<8x64xf32>
    %139 = arith.truncf %138 : vector<8x64xf32> to vector<8x64xbf16>
    %c0_55 = arith.constant 0 : index
    %c0_56 = arith.constant 0 : index
    %140 = vector.load %arg11[%c0_55, %c0_56] : memref<64x32xbf16, #tpu.memory_space<vmem>>, vector<64x32xbf16>
    %cst_57 = arith.constant dense<0.000000e+00> : vector<8x32xf32>
    %141 = tpu.matmul %139, %140, %cst_57 {dimension_numbers = #tpu.dot_dimension_numbers<[1], [0], [0], [1], [0, 0, 1, 1], [], []>} : vector<8x64xbf16>, vector<64x32xbf16>, vector<8x32xf32> -> vector<8x32xf32>
    %c0_58 = arith.constant 0 : index
    %c0_59 = arith.constant 0 : index
    %142 = vector.load %arg12[%c0_58, %c0_59] : memref<1x32xf32, #tpu.memory_space<vmem>>, vector<1x32xf32>
    %143 = vector.broadcast %142 : vector<1x32xf32> to vector<8x32xf32>
    %144 = arith.addf %141, %143 : vector<8x32xf32>
    %145 = arith.addf %130, %144 : vector<8x32xf32>
    %c0_60 = arith.constant 0 : index
    %c0_61 = arith.constant 0 : index
    %146 = vector.load %arg13[%c0_60, %c0_61] : memref<1x32xf32, #tpu.memory_space<vmem>>, vector<1x32xf32>
    %c0_62 = arith.constant 0 : index
    %c0_63 = arith.constant 0 : index
    %147 = vector.load %arg14[%c0_62, %c0_63] : memref<1x32xf32, #tpu.memory_space<vmem>>, vector<1x32xf32>
    %cst_64 = arith.constant dense<0.000000e+00> : vector<8xf32>
    %148 = vector.multi_reduction <add>, %145, %cst_64 [1] : vector<8x32xf32> to vector<8xf32>
    %149 = vector.shape_cast %148 : vector<8xf32> to vector<8x1xf32>
    %cst_65 = arith.constant 3.200000e+01 : f32
    %150 = vector.broadcast %cst_65 : f32 to vector<8x1xf32>
    %151 = arith.divf %149, %150 : vector<8x1xf32>
    %152 = vector.broadcast %151 : vector<8x1xf32> to vector<8x32xf32>
    %153 = arith.subf %145, %152 : vector<8x32xf32>
    %154 = arith.mulf %153, %153 : vector<8x32xf32>
    %cst_66 = arith.constant dense<0.000000e+00> : vector<8xf32>
    %155 = vector.multi_reduction <add>, %154, %cst_66 [1] : vector<8x32xf32> to vector<8xf32>
    %156 = vector.shape_cast %155 : vector<8xf32> to vector<8x1xf32>
    %cst_67 = arith.constant 3.200000e+01 : f32
    %157 = vector.broadcast %cst_67 : f32 to vector<8x1xf32>
    %158 = arith.divf %156, %157 : vector<8x1xf32>
    %cst_68 = arith.constant 9.99999974E-6 : f32
    %159 = vector.broadcast %cst_68 : f32 to vector<8x1xf32>
    %160 = arith.addf %158, %159 : vector<8x1xf32>
    %161 = math.rsqrt %160 : vector<8x1xf32>
    %162 = vector.broadcast %161 : vector<8x1xf32> to vector<8x32xf32>
    %163 = arith.mulf %153, %162 : vector<8x32xf32>
    %164 = vector.broadcast %146 : vector<1x32xf32> to vector<8x32xf32>
    %165 = arith.mulf %163, %164 : vector<8x32xf32>
    %166 = vector.broadcast %147 : vector<1x32xf32> to vector<8x32xf32>
    %167 = arith.addf %165, %166 : vector<8x32xf32>
    %c0_69 = arith.constant 0 : index
    %c0_70 = arith.constant 0 : index
    %c0_71 = arith.constant 0 : index
    %168 = vector.load %arg15[%c0_69, %c0_70, %c0_71] : memref<1x8x32xf32, #tpu.memory_space<vmem>>, vector<1x8x32xf32>
    %169 = vector.shape_cast %168 : vector<1x8x32xf32> to vector<8x32xf32>
    %170 = vector.shape_cast %167 : vector<8x32xf32> to vector<1x8x32xf32>
    tpu.vector_store %arg15[%c0_69, %c0_70, %c0_71], %170 {strides = array<i32>} : memref<1x8x32xf32, #tpu.memory_space<vmem>>, vector<1x8x32xf32>,
    return
  }
  func.func @transform_0(%arg0: i32) -> (i32, i32, i32) {
    %c0_i32 = arith.constant 0 : i32
    %c0_i32_0 = arith.constant 0 : i32
    %c0_i32_1 = arith.constant 0 : i32
    return %arg0, %c0_i32, %c0_i32_0 : i32, i32, i32
  }
  func.func @transform_1(%arg0: i32) -> (i32, i32) {
    %c0_i32 = arith.constant 0 : i32
    %c0_i32_0 = arith.constant 0 : i32
    %c0_i32_1 = arith.constant 0 : i32
    return %c0_i32, %c0_i32_0 : i32, i32
  }
  func.func @transform_2(%arg0: i32) -> (i32, i32) {
    %c0_i32 = arith.constant 0 : i32
    %c0_i32_0 = arith.constant 0 : i32
    %c0_i32_1 = arith.constant 0 : i32
    return %c0_i32, %c0_i32_0 : i32, i32
  }
  func.func @transform_3(%arg0: i32) -> (i32, i32) {
    %c0_i32 = arith.constant 0 : i32
    %c0_i32_0 = arith.constant 0 : i32
    %c0_i32_1 = arith.constant 0 : i32
    return %c0_i32, %c0_i32_0 : i32, i32
  }
  func.func @transform_4(%arg0: i32) -> (i32, i32) {
    %c0_i32 = arith.constant 0 : i32
    %c0_i32_0 = arith.constant 0 : i32
    %c0_i32_1 = arith.constant 0 : i32
    return %c0_i32, %c0_i32_0 : i32, i32
  }
  func.func @transform_5(%arg0: i32) -> (i32, i32) {
    %c0_i32 = arith.constant 0 : i32
    %c0_i32_0 = arith.constant 0 : i32
    %c0_i32_1 = arith.constant 0 : i32
    return %c0_i32, %c0_i32_0 : i32, i32
  }
  func.func @transform_6(%arg0: i32) -> (i32, i32) {
    %c0_i32 = arith.constant 0 : i32
    %c0_i32_0 = arith.constant 0 : i32
    %c0_i32_1 = arith.constant 0 : i32
    return %c0_i32, %c0_i32_0 : i32, i32
  }
  func.func @transform_7(%arg0: i32) -> (i32, i32) {
    %c0_i32 = arith.constant 0 : i32
    %c0_i32_0 = arith.constant 0 : i32
    %c0_i32_1 = arith.constant 0 : i32
    return %c0_i32, %c0_i32_0 : i32, i32
  }
  func.func @transform_8(%arg0: i32) -> (i32, i32) {
    %c0_i32 = arith.constant 0 : i32
    %c0_i32_0 = arith.constant 0 : i32
    %c0_i32_1 = arith.constant 0 : i32
    return %c0_i32, %c0_i32_0 : i32, i32
  }
  func.func @transform_9(%arg0: i32) -> (i32, i32) {
    %c0_i32 = arith.constant 0 : i32
    %c0_i32_0 = arith.constant 0 : i32
    %c0_i32_1 = arith.constant 0 : i32
    return %c0_i32, %c0_i32_0 : i32, i32
  }
  func.func @transform_10(%arg0: i32) -> (i32, i32) {
    %c0_i32 = arith.constant 0 : i32
    %c0_i32_0 = arith.constant 0 : i32
    %c0_i32_1 = arith.constant 0 : i32
    return %c0_i32, %c0_i32_0 : i32, i32
  }
  func.func @transform_11(%arg0: i32) -> (i32, i32) {
    %c0_i32 = arith.constant 0 : i32
    %c0_i32_0 = arith.constant 0 : i32
    %c0_i32_1 = arith.constant 0 : i32
    return %c0_i32, %c0_i32_0 : i32, i32
  }
  func.func @transform_12(%arg0: i32) -> (i32, i32) {
    %c0_i32 = arith.constant 0 : i32
    %c0_i32_0 = arith.constant 0 : i32
    %c0_i32_1 = arith.constant 0 : i32
    return %c0_i32, %c0_i32_0 : i32, i32
  }
  func.func @transform_13(%arg0: i32) -> (i32, i32) {
    %c0_i32 = arith.constant 0 : i32
    %c0_i32_0 = arith.constant 0 : i32
    %c0_i32_1 = arith.constant 0 : i32
    return %c0_i32, %c0_i32_0 : i32, i32
  }
  func.func @transform_14(%arg0: i32) -> (i32, i32, i32) {
    %c0_i32 = arith.constant 0 : i32
    %c0_i32_0 = arith.constant 0 : i32
    %c0_i32_1 = arith.constant 0 : i32
    return %arg0, %c0_i32, %c0_i32_0 : i32, i32, i32
  }
}

module attributes {stable_mosaic.version = 11 : i64} {
  func.func @_encoder_layer_kernel(%arg0: i32, %arg1: memref<1x8x32xf32, #tpu.memory_space<vmem>>, %arg2: memref<8x8xf32, #tpu.memory_space<vmem>>, %arg3: memref<32x96xbf16, #tpu.memory_space<vmem>>, %arg4: memref<1x96xf32, #tpu.memory_space<vmem>>, %arg5: memref<32x32xbf16, #tpu.memory_space<vmem>>, %arg6: memref<1x32xf32, #tpu.memory_space<vmem>>, %arg7: memref<1x32xf32, #tpu.memory_space<vmem>>, %arg8: memref<1x32xf32, #tpu.memory_space<vmem>>, %arg9: memref<32x64xbf16, #tpu.memory_space<vmem>>, %arg10: memref<1x64xf32, #tpu.memory_space<vmem>>, %arg11: memref<64x32xbf16, #tpu.memory_space<vmem>>, %arg12: memref<1x32xf32, #tpu.memory_space<vmem>>, %arg13: memref<1x32xf32, #tpu.memory_space<vmem>>, %arg14: memref<1x32xf32, #tpu.memory_space<vmem>>, %arg15: memref<1x8x32xf32, #tpu.memory_space<vmem>>, %arg16: memref<8x32xf32, #tpu.memory_space<vmem>>) attributes {dimension_semantics = [#tpu.dimension_semantics<parallel>], iteration_bounds = array<i64: 2>, scalar_prefetch = 0 : i64, scratch_operands = 1 : i64, tpu.core_type = #tpu.core_type<tc>, window_params = [{transform_indices = @transform_0, window_bounds = array<i64: 1, 8, 32>}, {pipeline_mode = #tpu.pipeline_mode<synchronous>, transform_indices = @transform_1, window_bounds = array<i64: 8, 8>}, {pipeline_mode = #tpu.pipeline_mode<synchronous>, transform_indices = @transform_2, window_bounds = array<i64: 32, 96>}, {pipeline_mode = #tpu.pipeline_mode<synchronous>, transform_indices = @transform_3, window_bounds = array<i64: 1, 96>}, {pipeline_mode = #tpu.pipeline_mode<synchronous>, transform_indices = @transform_4, window_bounds = array<i64: 32, 32>}, {pipeline_mode = #tpu.pipeline_mode<synchronous>, transform_indices = @transform_5, window_bounds = array<i64: 1, 32>}, {pipeline_mode = #tpu.pipeline_mode<synchronous>, transform_indices = @transform_6, window_bounds = array<i64: 1, 32>}, {pipeline_mode = #tpu.pipeline_mode<synchronous>, transform_indices = @transform_7, window_bounds = array<i64: 1, 32>}, {pipeline_mode = #tpu.pipeline_mode<synchronous>, transform_indices = @transform_8, window_bounds = array<i64: 32, 64>}, {pipeline_mode = #tpu.pipeline_mode<synchronous>, transform_indices = @transform_9, window_bounds = array<i64: 1, 64>}, {pipeline_mode = #tpu.pipeline_mode<synchronous>, transform_indices = @transform_10, window_bounds = array<i64: 64, 32>}, {pipeline_mode = #tpu.pipeline_mode<synchronous>, transform_indices = @transform_11, window_bounds = array<i64: 1, 32>}, {pipeline_mode = #tpu.pipeline_mode<synchronous>, transform_indices = @transform_12, window_bounds = array<i64: 1, 32>}, {pipeline_mode = #tpu.pipeline_mode<synchronous>, transform_indices = @transform_13, window_bounds = array<i64: 1, 32>}, {transform_indices = @transform_14, window_bounds = array<i64: 1, 8, 32>}]} {
    %c0 = arith.constant 0 : index
    %c0_0 = arith.constant 0 : index
    %c0_1 = arith.constant 0 : index
    %0 = vector.load %arg1[%c0, %c0_0, %c0_1] : memref<1x8x32xf32, #tpu.memory_space<vmem>>, vector<1x8x32xf32>
    %1 = vector.shape_cast %0 : vector<1x8x32xf32> to vector<8x32xf32>
    %c0_2 = arith.constant 0 : index
    %c0_3 = arith.constant 0 : index
    %2 = vector.load %arg2[%c0_2, %c0_3] : memref<8x8xf32, #tpu.memory_space<vmem>>, vector<8x8xf32>
    %3 = arith.truncf %1 : vector<8x32xf32> to vector<8x32xbf16>
    %c0_4 = arith.constant 0 : index
    %c0_5 = arith.constant 0 : index
    %4 = vector.load %arg3[%c0_4, %c0_5] : memref<32x96xbf16, #tpu.memory_space<vmem>>, vector<32x96xbf16>
    %cst = arith.constant dense<0.000000e+00> : vector<8x96xf32>
    %5 = tpu.matmul %3, %4, %cst {dimension_numbers = #tpu.dot_dimension_numbers<[1], [0], [0], [1], [0, 0, 1, 1], [], []>} : vector<8x32xbf16>, vector<32x96xbf16>, vector<8x96xf32> -> vector<8x96xf32>
    %c0_6 = arith.constant 0 : index
    %c0_7 = arith.constant 0 : index
    %6 = vector.load %arg4[%c0_6, %c0_7] : memref<1x96xf32, #tpu.memory_space<vmem>>, vector<1x96xf32>
    %7 = vector.broadcast %6 : vector<1x96xf32> to vector<8x96xf32>
    %8 = arith.addf %5, %7 : vector<8x96xf32>
    %9 = vector.extract_strided_slice %8 {offsets = [0, 0], sizes = [8, 8], strides = [1, 1]} : vector<8x96xf32> to vector<8x8xf32>
    %10 = vector.extract_strided_slice %8 {offsets = [0, 32], sizes = [8, 8], strides = [1, 1]} : vector<8x96xf32> to vector<8x8xf32>
    %11 = vector.extract_strided_slice %8 {offsets = [0, 64], sizes = [8, 8], strides = [1, 1]} : vector<8x96xf32> to vector<8x8xf32>
    %12 = arith.truncf %9 : vector<8x8xf32> to vector<8x8xbf16>
    %13 = arith.truncf %10 : vector<8x8xf32> to vector<8x8xbf16>
    %cst_8 = arith.constant dense<0.000000e+00> : vector<8x8xf32>
    %14 = tpu.matmul %12, %13, %cst_8 {dimension_numbers = #tpu.dot_dimension_numbers<[1], [1], [0], [0], [0, 0, 1, 0], [], []>} : vector<8x8xbf16>, vector<8x8xbf16>, vector<8x8xf32> -> vector<8x8xf32>
    %cst_9 = arith.constant 0.353553385 : f32
    %15 = vector.broadcast %cst_9 : f32 to vector<8x8xf32>
    %16 = arith.mulf %14, %15 : vector<8x8xf32>
    %17 = arith.addf %16, %2 : vector<8x8xf32>
    %cst_10 = arith.constant dense<0xFF800000> : vector<8xf32>
    %18 = vector.multi_reduction <maximumf>, %17, %cst_10 [1] : vector<8x8xf32> to vector<8xf32>
    %19 = vector.shape_cast %18 : vector<8xf32> to vector<8x1xf32>
    %20 = vector.broadcast %19 : vector<8x1xf32> to vector<8x8xf32>
    %21 = arith.subf %17, %20 : vector<8x8xf32>
    %22 = math.exp %21 : vector<8x8xf32>
    %cst_11 = arith.constant dense<0.000000e+00> : vector<8xf32>
    %23 = vector.multi_reduction <add>, %22, %cst_11 [1] : vector<8x8xf32> to vector<8xf32>
    %24 = vector.shape_cast %23 : vector<8xf32> to vector<8x1xf32>
    %25 = tpu.reciprocal %24 {approx = true} : vector<8x1xf32> -> vector<8x1xf32>
    %26 = vector.broadcast %25 : vector<8x1xf32> to vector<8x8xf32>
    %27 = arith.mulf %22, %26 : vector<8x8xf32>
    %28 = arith.truncf %27 : vector<8x8xf32> to vector<8x8xbf16>
    %29 = arith.truncf %11 : vector<8x8xf32> to vector<8x8xbf16>
    %cst_12 = arith.constant dense<0.000000e+00> : vector<8x8xf32>
    %30 = tpu.matmul %28, %29, %cst_12 {dimension_numbers = #tpu.dot_dimension_numbers<[1], [0], [0], [1], [0, 0, 1, 1], [], []>} : vector<8x8xbf16>, vector<8x8xbf16>, vector<8x8xf32> -> vector<8x8xf32>
    %c0_13 = arith.constant 0 : index
    %c0_14 = arith.constant 0 : index
    %31 = vector.load %arg16[%c0_13, %c0_14] : memref<8x32xf32, #tpu.memory_space<vmem>>, vector<8x8xf32>
    tpu.vector_store %arg16[%c0_13, %c0_14], %30 {strides = array<i32>} : memref<8x32xf32, #tpu.memory_space<vmem>>, vector<8x8xf32>,
    %32 = vector.extract_strided_slice %8 {offsets = [0, 8], sizes = [8, 8], strides = [1, 1]} : vector<8x96xf32> to vector<8x8xf32>
    %33 = vector.extract_strided_slice %8 {offsets = [0, 40], sizes = [8, 8], strides = [1, 1]} : vector<8x96xf32> to vector<8x8xf32>
    %34 = vector.extract_strided_slice %8 {offsets = [0, 72], sizes = [8, 8], strides = [1, 1]} : vector<8x96xf32> to vector<8x8xf32>
    %35 = arith.truncf %32 : vector<8x8xf32> to vector<8x8xbf16>
    %36 = arith.truncf %33 : vector<8x8xf32> to vector<8x8xbf16>
    %cst_15 = arith.constant dense<0.000000e+00> : vector<8x8xf32>
    %37 = tpu.matmul %35, %36, %cst_15 {dimension_numbers = #tpu.dot_dimension_numbers<[1], [1], [0], [0], [0, 0, 1, 0], [], []>} : vector<8x8xbf16>, vector<8x8xbf16>, vector<8x8xf32> -> vector<8x8xf32>
    %cst_16 = arith.constant 0.353553385 : f32
    %38 = vector.broadcast %cst_16 : f32 to vector<8x8xf32>
    %39 = arith.mulf %37, %38 : vector<8x8xf32>
    %40 = arith.addf %39, %2 : vector<8x8xf32>
    %cst_17 = arith.constant dense<0xFF800000> : vector<8xf32>
    %41 = vector.multi_reduction <maximumf>, %40, %cst_17 [1] : vector<8x8xf32> to vector<8xf32>
    %42 = vector.shape_cast %41 : vector<8xf32> to vector<8x1xf32>
    %43 = vector.broadcast %42 : vector<8x1xf32> to vector<8x8xf32>
    %44 = arith.subf %40, %43 : vector<8x8xf32>
    %45 = math.exp %44 : vector<8x8xf32>
    %cst_18 = arith.constant dense<0.000000e+00> : vector<8xf32>
    %46 = vector.multi_reduction <add>, %45, %cst_18 [1] : vector<8x8xf32> to vector<8xf32>
    %47 = vector.shape_cast %46 : vector<8xf32> to vector<8x1xf32>
    %48 = tpu.reciprocal %47 {approx = true} : vector<8x1xf32> -> vector<8x1xf32>
    %49 = vector.broadcast %48 : vector<8x1xf32> to vector<8x8xf32>
    %50 = arith.mulf %45, %49 : vector<8x8xf32>
    %51 = arith.truncf %50 : vector<8x8xf32> to vector<8x8xbf16>
    %52 = arith.truncf %34 : vector<8x8xf32> to vector<8x8xbf16>
    %cst_19 = arith.constant dense<0.000000e+00> : vector<8x8xf32>
    %53 = tpu.matmul %51, %52, %cst_19 {dimension_numbers = #tpu.dot_dimension_numbers<[1], [0], [0], [1], [0, 0, 1, 1], [], []>} : vector<8x8xbf16>, vector<8x8xbf16>, vector<8x8xf32> -> vector<8x8xf32>
    %c0_20 = arith.constant 0 : index
    %c8 = arith.constant 8 : index
    %54 = vector.load %arg16[%c0_20, %c8] : memref<8x32xf32, #tpu.memory_space<vmem>>, vector<8x8xf32>
    tpu.vector_store %arg16[%c0_20, %c8], %53 {strides = array<i32>} : memref<8x32xf32, #tpu.memory_space<vmem>>, vector<8x8xf32>,
    %55 = vector.extract_strided_slice %8 {offsets = [0, 16], sizes = [8, 8], strides = [1, 1]} : vector<8x96xf32> to vector<8x8xf32>
    %56 = vector.extract_strided_slice %8 {offsets = [0, 48], sizes = [8, 8], strides = [1, 1]} : vector<8x96xf32> to vector<8x8xf32>
    %57 = vector.extract_strided_slice %8 {offsets = [0, 80], sizes = [8, 8], strides = [1, 1]} : vector<8x96xf32> to vector<8x8xf32>
    %58 = arith.truncf %55 : vector<8x8xf32> to vector<8x8xbf16>
    %59 = arith.truncf %56 : vector<8x8xf32> to vector<8x8xbf16>
    %cst_21 = arith.constant dense<0.000000e+00> : vector<8x8xf32>
    %60 = tpu.matmul %58, %59, %cst_21 {dimension_numbers = #tpu.dot_dimension_numbers<[1], [1], [0], [0], [0, 0, 1, 0], [], []>} : vector<8x8xbf16>, vector<8x8xbf16>, vector<8x8xf32> -> vector<8x8xf32>
    %cst_22 = arith.constant 0.353553385 : f32
    %61 = vector.broadcast %cst_22 : f32 to vector<8x8xf32>
    %62 = arith.mulf %60, %61 : vector<8x8xf32>
    %63 = arith.addf %62, %2 : vector<8x8xf32>
    %cst_23 = arith.constant dense<0xFF800000> : vector<8xf32>
    %64 = vector.multi_reduction <maximumf>, %63, %cst_23 [1] : vector<8x8xf32> to vector<8xf32>
    %65 = vector.shape_cast %64 : vector<8xf32> to vector<8x1xf32>
    %66 = vector.broadcast %65 : vector<8x1xf32> to vector<8x8xf32>
    %67 = arith.subf %63, %66 : vector<8x8xf32>
    %68 = math.exp %67 : vector<8x8xf32>
    %cst_24 = arith.constant dense<0.000000e+00> : vector<8xf32>
    %69 = vector.multi_reduction <add>, %68, %cst_24 [1] : vector<8x8xf32> to vector<8xf32>
    %70 = vector.shape_cast %69 : vector<8xf32> to vector<8x1xf32>
    %71 = tpu.reciprocal %70 {approx = true} : vector<8x1xf32> -> vector<8x1xf32>
    %72 = vector.broadcast %71 : vector<8x1xf32> to vector<8x8xf32>
    %73 = arith.mulf %68, %72 : vector<8x8xf32>
    %74 = arith.truncf %73 : vector<8x8xf32> to vector<8x8xbf16>
    %75 = arith.truncf %57 : vector<8x8xf32> to vector<8x8xbf16>
    %cst_25 = arith.constant dense<0.000000e+00> : vector<8x8xf32>
    %76 = tpu.matmul %74, %75, %cst_25 {dimension_numbers = #tpu.dot_dimension_numbers<[1], [0], [0], [1], [0, 0, 1, 1], [], []>} : vector<8x8xbf16>, vector<8x8xbf16>, vector<8x8xf32> -> vector<8x8xf32>
    %c0_26 = arith.constant 0 : index
    %c16 = arith.constant 16 : index
    %77 = vector.load %arg16[%c0_26, %c16] : memref<8x32xf32, #tpu.memory_space<vmem>>, vector<8x8xf32>
    tpu.vector_store %arg16[%c0_26, %c16], %76 {strides = array<i32>} : memref<8x32xf32, #tpu.memory_space<vmem>>, vector<8x8xf32>,
    %78 = vector.extract_strided_slice %8 {offsets = [0, 24], sizes = [8, 8], strides = [1, 1]} : vector<8x96xf32> to vector<8x8xf32>
    %79 = vector.extract_strided_slice %8 {offsets = [0, 56], sizes = [8, 8], strides = [1, 1]} : vector<8x96xf32> to vector<8x8xf32>
    %80 = vector.extract_strided_slice %8 {offsets = [0, 88], sizes = [8, 8], strides = [1, 1]} : vector<8x96xf32> to vector<8x8xf32>
    %81 = arith.truncf %78 : vector<8x8xf32> to vector<8x8xbf16>
    %82 = arith.truncf %79 : vector<8x8xf32> to vector<8x8xbf16>
    %cst_27 = arith.constant dense<0.000000e+00> : vector<8x8xf32>
    %83 = tpu.matmul %81, %82, %cst_27 {dimension_numbers = #tpu.dot_dimension_numbers<[1], [1], [0], [0], [0, 0, 1, 0], [], []>} : vector<8x8xbf16>, vector<8x8xbf16>, vector<8x8xf32> -> vector<8x8xf32>
    %cst_28 = arith.constant 0.353553385 : f32
    %84 = vector.broadcast %cst_28 : f32 to vector<8x8xf32>
    %85 = arith.mulf %83, %84 : vector<8x8xf32>
    %86 = arith.addf %85, %2 : vector<8x8xf32>
    %cst_29 = arith.constant dense<0xFF800000> : vector<8xf32>
    %87 = vector.multi_reduction <maximumf>, %86, %cst_29 [1] : vector<8x8xf32> to vector<8xf32>
    %88 = vector.shape_cast %87 : vector<8xf32> to vector<8x1xf32>
    %89 = vector.broadcast %88 : vector<8x1xf32> to vector<8x8xf32>
    %90 = arith.subf %86, %89 : vector<8x8xf32>
    %91 = math.exp %90 : vector<8x8xf32>
    %cst_30 = arith.constant dense<0.000000e+00> : vector<8xf32>
    %92 = vector.multi_reduction <add>, %91, %cst_30 [1] : vector<8x8xf32> to vector<8xf32>
    %93 = vector.shape_cast %92 : vector<8xf32> to vector<8x1xf32>
    %94 = tpu.reciprocal %93 {approx = true} : vector<8x1xf32> -> vector<8x1xf32>
    %95 = vector.broadcast %94 : vector<8x1xf32> to vector<8x8xf32>
    %96 = arith.mulf %91, %95 : vector<8x8xf32>
    %97 = arith.truncf %96 : vector<8x8xf32> to vector<8x8xbf16>
    %98 = arith.truncf %80 : vector<8x8xf32> to vector<8x8xbf16>
    %cst_31 = arith.constant dense<0.000000e+00> : vector<8x8xf32>
    %99 = tpu.matmul %97, %98, %cst_31 {dimension_numbers = #tpu.dot_dimension_numbers<[1], [0], [0], [1], [0, 0, 1, 1], [], []>} : vector<8x8xbf16>, vector<8x8xbf16>, vector<8x8xf32> -> vector<8x8xf32>
    %c0_32 = arith.constant 0 : index
    %c24 = arith.constant 24 : index
    %100 = vector.load %arg16[%c0_32, %c24] : memref<8x32xf32, #tpu.memory_space<vmem>>, vector<8x8xf32>
    tpu.vector_store %arg16[%c0_32, %c24], %99 {strides = array<i32>} : memref<8x32xf32, #tpu.memory_space<vmem>>, vector<8x8xf32>,
    %c0_33 = arith.constant 0 : index
    %c0_34 = arith.constant 0 : index
    %101 = vector.load %arg16[%c0_33, %c0_34] : memref<8x32xf32, #tpu.memory_space<vmem>>, vector<8x32xf32>
    %102 = arith.truncf %101 : vector<8x32xf32> to vector<8x32xbf16>
    %c0_35 = arith.constant 0 : index
    %c0_36 = arith.constant 0 : index
    %103 = vector.load %arg5[%c0_35, %c0_36] : memref<32x32xbf16, #tpu.memory_space<vmem>>, vector<32x32xbf16>
    %cst_37 = arith.constant dense<0.000000e+00> : vector<8x32xf32>
    %104 = tpu.matmul %102, %103, %cst_37 {dimension_numbers = #tpu.dot_dimension_numbers<[1], [0], [0], [1], [0, 0, 1, 1], [], []>} : vector<8x32xbf16>, vector<32x32xbf16>, vector<8x32xf32> -> vector<8x32xf32>
    %c0_38 = arith.constant 0 : index
    %c0_39 = arith.constant 0 : index
    %105 = vector.load %arg6[%c0_38, %c0_39] : memref<1x32xf32, #tpu.memory_space<vmem>>, vector<1x32xf32>
    %106 = vector.broadcast %105 : vector<1x32xf32> to vector<8x32xf32>
    %107 = arith.addf %104, %106 : vector<8x32xf32>
    %108 = arith.addf %1, %107 : vector<8x32xf32>
    %c0_40 = arith.constant 0 : index
    %c0_41 = arith.constant 0 : index
    %109 = vector.load %arg7[%c0_40, %c0_41] : memref<1x32xf32, #tpu.memory_space<vmem>>, vector<1x32xf32>
    %c0_42 = arith.constant 0 : index
    %c0_43 = arith.constant 0 : index
    %110 = vector.load %arg8[%c0_42, %c0_43] : memref<1x32xf32, #tpu.memory_space<vmem>>, vector<1x32xf32>
    %cst_44 = arith.constant dense<0.000000e+00> : vector<8xf32>
    %111 = vector.multi_reduction <add>, %108, %cst_44 [1] : vector<8x32xf32> to vector<8xf32>
    %112 = vector.shape_cast %111 : vector<8xf32> to vector<8x1xf32>
    %cst_45 = arith.constant 3.200000e+01 : f32
    %113 = vector.broadcast %cst_45 : f32 to vector<8x1xf32>
    %114 = arith.divf %112, %113 : vector<8x1xf32>
    %115 = vector.broadcast %114 : vector<8x1xf32> to vector<8x32xf32>
    %116 = arith.subf %108, %115 : vector<8x32xf32>
    %117 = arith.mulf %116, %116 : vector<8x32xf32>
    %cst_46 = arith.constant dense<0.000000e+00> : vector<8xf32>
    %118 = vector.multi_reduction <add>, %117, %cst_46 [1] : vector<8x32xf32> to vector<8xf32>
    %119 = vector.shape_cast %118 : vector<8xf32> to vector<8x1xf32>
    %cst_47 = arith.constant 3.200000e+01 : f32
    %120 = vector.broadcast %cst_47 : f32 to vector<8x1xf32>
    %121 = arith.divf %119, %120 : vector<8x1xf32>
    %cst_48 = arith.constant 9.99999974E-6 : f32
    %122 = vector.broadcast %cst_48 : f32 to vector<8x1xf32>
    %123 = arith.addf %121, %122 : vector<8x1xf32>
    %124 = math.rsqrt %123 : vector<8x1xf32>
    %125 = vector.broadcast %124 : vector<8x1xf32> to vector<8x32xf32>
    %126 = arith.mulf %116, %125 : vector<8x32xf32>
    %127 = vector.broadcast %109 : vector<1x32xf32> to vector<8x32xf32>
    %128 = arith.mulf %126, %127 : vector<8x32xf32>
    %129 = vector.broadcast %110 : vector<1x32xf32> to vector<8x32xf32>
    %130 = arith.addf %128, %129 : vector<8x32xf32>
    %131 = arith.truncf %130 : vector<8x32xf32> to vector<8x32xbf16>
    %c0_49 = arith.constant 0 : index
    %c0_50 = arith.constant 0 : index
    %132 = vector.load %arg9[%c0_49, %c0_50] : memref<32x64xbf16, #tpu.memory_space<vmem>>, vector<32x64xbf16>
    %cst_51 = arith.constant dense<0.000000e+00> : vector<8x64xf32>
    %133 = tpu.matmul %131, %132, %cst_51 {dimension_numbers = #tpu.dot_dimension_numbers<[1], [0], [0], [1], [0, 0, 1, 1], [], []>} : vector<8x32xbf16>, vector<32x64xbf16>, vector<8x64xf32> -> vector<8x64xf32>
    %c0_52 = arith.constant 0 : index
    %c0_53 = arith.constant 0 : index
    %134 = vector.load %arg10[%c0_52, %c0_53] : memref<1x64xf32, #tpu.memory_space<vmem>>, vector<1x64xf32>
    %135 = vector.broadcast %134 : vector<1x64xf32> to vector<8x64xf32>
    %136 = arith.addf %133, %135 : vector<8x64xf32>
    %cst_54 = arith.constant 0.000000e+00 : f32
    %137 = vector.broadcast %cst_54 : f32 to vector<8x64xf32>
    %138 = arith.maximumf %136, %137 : vector<8x64xf32>
    %139 = arith.truncf %138 : vector<8x64xf32> to vector<8x64xbf16>
    %c0_55 = arith.constant 0 : index
    %c0_56 = arith.constant 0 : index
    %140 = vector.load %arg11[%c0_55, %c0_56] : memref<64x32xbf16, #tpu.memory_space<vmem>>, vector<64x32xbf16>
    %cst_57 = arith.constant dense<0.000000e+00> : vector<8x32xf32>
    %141 = tpu.matmul %139, %140, %cst_57 {dimension_numbers = #tpu.dot_dimension_numbers<[1], [0], [0], [1], [0, 0, 1, 1], [], []>} : vector<8x64xbf16>, vector<64x32xbf16>, vector<8x32xf32> -> vector<8x32xf32>
    %c0_58 = arith.constant 0 : index
    %c0_59 = arith.constant 0 : index
    %142 = vector.load %arg12[%c0_58, %c0_59] : memref<1x32xf32, #tpu.memory_space<vmem>>, vector<1x32xf32>
    %143 = vector.broadcast %142 : vector<1x32xf32> to vector<8x32xf32>
    %144 = arith.addf %141, %143 : vector<8x32xf32>
    %145 = arith.addf %130, %144 : vector<8x32xf32>
    %c0_60 = arith.constant 0 : index
    %c0_61 = arith.constant 0 : index
    %146 = vector.load %arg13[%c0_60, %c0_61] : memref<1x32xf32, #tpu.memory_space<vmem>>, vector<1x32xf32>
    %c0_62 = arith.constant 0 : index
    %c0_63 = arith.constant 0 : index
    %147 = vector.load %arg14[%c0_62, %c0_63] : memref<1x32xf32, #tpu.memory_space<vmem>>, vector<1x32xf32>
    %cst_64 = arith.constant dense<0.000000e+00> : vector<8xf32>
    %148 = vector.multi_reduction <add>, %145, %cst_64 [1] : vector<8x32xf32> to vector<8xf32>
    %149 = vector.shape_cast %148 : vector<8xf32> to vector<8x1xf32>
    %cst_65 = arith.constant 3.200000e+01 : f32
    %150 = vector.broadcast %cst_65 : f32 to vector<8x1xf32>
    %151 = arith.divf %149, %150 : vector<8x1xf32>
    %152 = vector.broadcast %151 : vector<8x1xf32> to vector<8x32xf32>
    %153 = arith.subf %145, %152 : vector<8x32xf32>
    %154 = arith.mulf %153, %153 : vector<8x32xf32>
    %cst_66 = arith.constant dense<0.000000e+00> : vector<8xf32>
    %155 = vector.multi_reduction <add>, %154, %cst_66 [1] : vector<8x32xf32> to vector<8xf32>
    %156 = vector.shape_cast %155 : vector<8xf32> to vector<8x1xf32>
    %cst_67 = arith.constant 3.200000e+01 : f32
    %157 = vector.broadcast %cst_67 : f32 to vector<8x1xf32>
    %158 = arith.divf %156, %157 : vector<8x1xf32>
    %cst_68 = arith.constant 9.99999974E-6 : f32
    %159 = vector.broadcast %cst_68 : f32 to vector<8x1xf32>
    %160 = arith.addf %158, %159 : vector<8x1xf32>
    %161 = math.rsqrt %160 : vector<8x1xf32>
    %162 = vector.broadcast %161 : vector<8x1xf32> to vector<8x32xf32>
    %163 = arith.mulf %153, %162 : vector<8x32xf32>
    %164 = vector.broadcast %146 : vector<1x32xf32> to vector<8x32xf32>
    %165 = arith.mulf %163, %164 : vector<8x32xf32>
    %166 = vector.broadcast %147 : vector<1x32xf32> to vector<8x32xf32>
    %167 = arith.addf %165, %166 : vector<8x32xf32>
    %c0_69 = arith.constant 0 : index
    %c0_70 = arith.constant 0 : index
    %c0_71 = arith.constant 0 : index
    %168 = vector.load %arg15[%c0_69, %c0_70, %c0_71] : memref<1x8x32xf32, #tpu.memory_space<vmem>>, vector<1x8x32xf32>
    %169 = vector.shape_cast %168 : vector<1x8x32xf32> to vector<8x32xf32>
    %170 = vector.shape_cast %167 : vector<8x32xf32> to vector<1x8x32xf32>
    tpu.vector_store %arg15[%c0_69, %c0_70, %c0_71], %170 {strides = array<i32>} : memref<1x8x32xf32, #tpu.memory_space<vmem>>, vector<1x8x32xf32>,
    return
  }
  func.func @transform_0(%arg0: i32) -> (i32, i32, i32) {
    %c0_i32 = arith.constant 0 : i32
    %c0_i32_0 = arith.constant 0 : i32
    %c0_i32_1 = arith.constant 0 : i32
    return %arg0, %c0_i32, %c0_i32_0 : i32, i32, i32
  }
  func.func @transform_1(%arg0: i32) -> (i32, i32) {
    %c0_i32 = arith.constant 0 : i32
    %c0_i32_0 = arith.constant 0 : i32
    %c0_i32_1 = arith.constant 0 : i32
    return %c0_i32, %c0_i32_0 : i32, i32
  }
  func.func @transform_2(%arg0: i32) -> (i32, i32) {
    %c0_i32 = arith.constant 0 : i32
    %c0_i32_0 = arith.constant 0 : i32
    %c0_i32_1 = arith.constant 0 : i32
    return %c0_i32, %c0_i32_0 : i32, i32
  }
  func.func @transform_3(%arg0: i32) -> (i32, i32) {
    %c0_i32 = arith.constant 0 : i32
    %c0_i32_0 = arith.constant 0 : i32
    %c0_i32_1 = arith.constant 0 : i32
    return %c0_i32, %c0_i32_0 : i32, i32
  }
  func.func @transform_4(%arg0: i32) -> (i32, i32) {
    %c0_i32 = arith.constant 0 : i32
    %c0_i32_0 = arith.constant 0 : i32
    %c0_i32_1 = arith.constant 0 : i32
    return %c0_i32, %c0_i32_0 : i32, i32
  }
  func.func @transform_5(%arg0: i32) -> (i32, i32) {
    %c0_i32 = arith.constant 0 : i32
    %c0_i32_0 = arith.constant 0 : i32
    %c0_i32_1 = arith.constant 0 : i32
    return %c0_i32, %c0_i32_0 : i32, i32
  }
  func.func @transform_6(%arg0: i32) -> (i32, i32) {
    %c0_i32 = arith.constant 0 : i32
    %c0_i32_0 = arith.constant 0 : i32
    %c0_i32_1 = arith.constant 0 : i32
    return %c0_i32, %c0_i32_0 : i32, i32
  }
  func.func @transform_7(%arg0: i32) -> (i32, i32) {
    %c0_i32 = arith.constant 0 : i32
    %c0_i32_0 = arith.constant 0 : i32
    %c0_i32_1 = arith.constant 0 : i32
    return %c0_i32, %c0_i32_0 : i32, i32
  }
  func.func @transform_8(%arg0: i32) -> (i32, i32) {
    %c0_i32 = arith.constant 0 : i32
    %c0_i32_0 = arith.constant 0 : i32
    %c0_i32_1 = arith.constant 0 : i32
    return %c0_i32, %c0_i32_0 : i32, i32
  }
  func.func @transform_9(%arg0: i32) -> (i32, i32) {
    %c0_i32 = arith.constant 0 : i32
    %c0_i32_0 = arith.constant 0 : i32
    %c0_i32_1 = arith.constant 0 : i32
    return %c0_i32, %c0_i32_0 : i32, i32
  }
  func.func @transform_10(%arg0: i32) -> (i32, i32) {
    %c0_i32 = arith.constant 0 : i32
    %c0_i32_0 = arith.constant 0 : i32
    %c0_i32_1 = arith.constant 0 : i32
    return %c0_i32, %c0_i32_0 : i32, i32
  }
  func.func @transform_11(%arg0: i32) -> (i32, i32) {
    %c0_i32 = arith.constant 0 : i32
    %c0_i32_0 = arith.constant 0 : i32
    %c0_i32_1 = arith.constant 0 : i32
    return %c0_i32, %c0_i32_0 : i32, i32
  }
  func.func @transform_12(%arg0: i32) -> (i32, i32) {
    %c0_i32 = arith.constant 0 : i32
    %c0_i32_0 = arith.constant 0 : i32
    %c0_i32_1 = arith.constant 0 : i32
    return %c0_i32, %c0_i32_0 : i32, i32
  }
  func.func @transform_13(%arg0: i32) -> (i32, i32) {
    %c0_i32 = arith.constant 0 : i32
    %c0_i32_0 = arith.constant 0 : i32
    %c0_i32_1 = arith.constant 0 : i32
    return %c0_i32, %c0_i32_0 : i32, i32
  }
  func.func @transform_14(%arg0: i32) -> (i32, i32, i32) {
    %c0_i32 = arith.constant 0 : i32
    %c0_i32_0 = arith.constant 0 : i32
    %c0_i32_1 = arith.constant 0 : i32
    return %arg0, %c0_i32, %c0_i32_0 : i32, i32, i32
  }
}

</mosaic_0001>

<bundles_post_ra>
// kernel: proposed_encoder_forward.3
= control target key start
LH: loop header
LB: loop body
LE: loop exit
PB: predicated region body
PF: predicated region fallthrough
CT: control target
= control target key end

     0   :  { %s2004_s0 = inlined_call_operand.vmem [shape: f32[2,8,32], index: 0, kind: input, shape index: {}]   ;;  %s2005_s1 = inlined_call_operand.vmem [shape: f32[8,8], index: 1, kind: input, shape index: {}]   ;;  %s2006_s2 = inlined_call_operand.vmem [shape: bf16[32,96], index: 2, kind: input, shape index: {}]   ;;  %s2007_s3 = inlined_call_operand.vmem [shape: f32[1,96], index: 3, kind: input, shape index: {}]   ;;  %s2008_s4 = inlined_call_operand.vmem [shape: bf16[32,32], index: 4, kind: input, shape index: {}]   ;;  %s2009_s5 = inlined_call_operand.vmem [shape: f32[1,32], index: 5, kind: input, shape index: {}]   ;;  %s2010_s6 = inlined_call_operand.vmem [shape: f32[1,32], index: 6, kind: input, shape index: {}]   ;;  %s2011_s7 = inlined_call_operand.vmem [shape: f32[1,32], index: 7, kind: input, shape index: {}]   ;;  %s2012_s8 = inlined_call_operand.vmem [shape: bf16[32,64], index: 8, kind: input, shape index: {}]   ;;  %s2013_s9 = inlined_call_operand.vmem [shape: f32[1,64], index: 9, kind: input, shape index: {}]   ;;  %s2014_s10 = inlined_call_operand.vmem [shape: bf16[64,32], index: 10, kind: input, shape index: {}]   ;;  %s2015_s11 = inlined_call_operand.vmem [shape: f32[1,32], index: 11, kind: input, shape index: {}]   ;;  %s2016_s12 = inlined_call_operand.vmem [shape: f32[1,32], index: 12, kind: input, shape index: {}]   ;;  %s2017_s13 = inlined_call_operand.vmem [shape: f32[1,32], index: 13, kind: input, shape index: {}]   ;;  %s2018_s14 = inlined_call_operand.hbm [shape: f32[2,8,32], index: 14, kind: output, shape index: {}]  }
   0x1   :  { %2019 = sst [smem:[#allocation6_spill]] %s2004_s0 }
   0x2   :  { %2020 = sst [smem:[#allocation7_spill]] %s2005_s1 }
   0x3   :  { %2021 = sst [smem:[#allocation8_spill]] %s2006_s2 }
   0x4   :  { %2022 = sst [smem:[#allocation9_spill]] %s2007_s3 }
   0x5   :  { %2023 = sst [smem:[#allocation10_spill]] %s2008_s4 }
   0x6   :  { %19 = vsyncpa [#allocation4], 0 }
   0x7   :  { %21 = vsyncpa [#allocation4 + $0x1], 0  ;;  %s1753_s29 = smov 0   ;;  %s1755_s30 = smov 0  }
   0x8   :  { %s1757_s15 = smov 0   ;;  %s1759_s16 = smov 0  }
   0x9 LB: > { %s1774_s17 = sadd.s32 4294967295, %s1659_s16   ;;  %s1358_s18 = sadd.s32 4294967294, %s1659_s16   ;;  %s1659_s16 = sphi %s1759_s16, %s2034_s16   ;;  %s1655_s15 = sphi %s1757_s15, %s2033_s15   ;;  %s1651_s30 = sphi %s1755_s30, %s2032_s30   ;;  %s1647_s29 = sphi %s1753_s29, %s2031_s29  }
   0xa   : > { %s1778_s19 = sadd.s32 1, %s1659_s16   ;;  %s333_s20 = sadd.s32 1, %s1655_s15 }
   0xb   : > { %s330_s21 = ssub.s32 %s1659_s16, %s1778_s19  ;;  %p343_p0 = scmp.ne.s32.totalorder %s1655_s15, %s1651_s30 }
   0xc   : > { %p331_p1 = scmp.eq.s32.totalorder %s330_s21, 0  ;;  %p344_p2 = scmp.eq.s32.totalorder %s1774_s17, 1 }
   0xd   : > { %p349_p3 = scmp.ne.s32.totalorder %s1651_s30, %s1647_s29  ;;  %p350_p4 = scmp.eq.s32.totalorder %s1358_s18, 1 }
   0xe   : > { %s1789_s22 = scalar_select %p331_p1, %s1655_s15, %s333_s20  }
   0xf   : > { %p1791_p5 = por %p344_p2, %p343_p0  ;;  %p1795_p6 = por %p350_p4, %p349_p3 }
  0x10   : > { %p1361_p7 = scmp.ge.s32.totalorder %s1659_s16, 1  ;;  %p414_p8 = scmp.lt.s32.totalorder %s1659_s16, 3 }
  0x12   : > { %p415_p9 = pnand %p1361_p7, %p414_p8 }
  0x13   : > { %s2026_s2 = sld [smem:[#allocation8_spill]] (!%p415_p9)  ;;  %v1661_v1 = vmov (!%p415_p9), 0.0   ;;  %vm1662_vm0 = vmmov (!%p415_p9), 0   ;;  %p459_p10 = scmp.lt.s32.totalorder (!%p415_p9), %s1774_s17, 1  ;;  %vm490_vm1 = vcmask (!%p415_p9), 261120   ;;  %vm538_vm2 = vcmask (!%p415_p9), 64512  }
  0x14   : > { %418 = sbr.rel (%p415_p9) target bundleno = 2596 (0xa24), region = 76  ;;  %1428 = vmatprep.subr.bf16.mxu0 (!%p415_p9), %v1661_v1  ;;  %1436 = vmatprep.subr.bf16.mxu1 (!%p415_p9), %v1661_v1  ;;  %s2027_s0 = sld [smem:[#allocation6_spill]] (!%p415_p9)  ;;  %vm604_vm3 = vcmask (!%p415_p9), 1043456   ;;  %vm765_vm4 = vcmask (!%p415_p9), 130112   ;;  %vm883_vm5 = vcmask (!%p415_p9), 195712   ;;  %vm1001_vm6 = vcmask (!%p415_p9), 261312  }
  0x15   : > { %1432 = vmatprep.mubr.msk.bf16.mxu0 (!%p415_p9), %vm1662_vm0, %v1661_v1  ;;  %1438 = vmatprep.mubr.msk.bf16.mxu1 (!%p415_p9), %vm1662_vm0, %v1661_v1  ;;  %s2028_s3 = sld [smem:[#allocation9_spill]] (!%p415_p9)  ;;  %s1665_s21 = smov (!%p415_p9), 80   ;;  %vm1210_vm7 = vcmask (!%p415_p9), 523264  }
  0x16   : > { %s1666_s25 = smov (!%p415_p9), 88   ;;  %s1668_s27 = smov (!%p415_p9), 112  }
  0x17   : > { %s1669_s28 = smov (!%p415_p9), 104   ;;  %s2029_s1 = sld [smem:[#allocation7_spill]] (!%p415_p9) }
  0x18   : > { %s2030_s4 = sld [smem:[#allocation10_spill]] (!%p415_p9) }
  0x19   : > { %v1567_v0 = vld [vmem:[%s2026_s2] sm:$0xff] (!%p415_p9)   ;;  %v1568_v2 = vld [vmem:[%s2026_s2 + $0x8] sm:$0xff] (!%p415_p9)  }
  0x1a   : > { %1429 = vmatpush3.bf16.msra.mxu0 (!%p415_p9), %v1567_v0 }
  0x1b   : > { %1430 = vmatprep.subr.bf16.mxu0 %v1661_v1  ;;  %s460_s18 = scalar_select %p459_p10, %s1774_s17, 1  ;;  %v1364_v5 = vld [vmem:[%s2028_s3] ss:$0 sm:$0xff] }
  0x1d   : > { %s1363_s20 = sshll.u32 %s460_s18, 3  ;;  %s1663_s18 = smov 120   ;;  %v465_v24 = vld [vmem:[%s2029_s1] sm:$0xff] }
  0x1e   : > { %1431 = vmatpush3.bf16.msra.mxu0 %v1568_v2  ;;  %s462_s26 = scalar_lea.vmem %s2027_s0, %s1363_s20  ;;  %s1664_s20 = smov 96  }
  0x1f   : > { %1442 = vmatprep.subr.bf16.mxu0 %v1661_v1  ;;  %v1820_v3 = vld [vmem:[%s462_s26] sm:$0xff]  ;;  %s1667_s26 = smov 72   ;;  %s456_s0 = sand.u32 1, %s1651_s30  }
  0x20   : > { %v466_v4 = vpack.c.bf16 %v1820_v3, %v1820_v3 }
  0x22   : > { %1433 = vmatmul.mubr.msk.bf16.vlgmr.msra.gmra.mrb[0].mxu0 %vm490_vm1, %v466_v4 }
  0x23   : > { %1444 = vmatprep.mubr.msk.bf16.mxu0 %vm1662_vm0, %v1661_v1 }
  0xf5   : > { %v528_v6 = vpop.f32.mrb[0].mxu0 }
  0xf6   : > { %v529_v7 = vadd.f32 %v1364_v5, %v528_v6  ;;  %v1434_v8 = vpop.f32.mrb[1].mxu0 }
  0xf7   : > { %v531_v9 = vpop.f32.mrb[2].mxu0 }
  0xf8   : > { %v1830_v10 = vpack.c.bf16 %v529_v7, %v529_v7  ;;  %v1435_v11 = vpop.f32.mrb[3].mxu0 }
  0xfa   : > { %649 = vrot.lane.b32.xlu1 %v1830_v10, %s1663_s18  ;;  %536 = vrot.lane.b32.xlu0 %v1830_v10, %s1664_s20 }
  0xfe   : > { %769 = vrot.lane.b32.xlu1 %v1830_v10, %s1665_s21  ;;  %651 = vrot.lane.b32.xlu0 %v1830_v10, %s1666_s25  ;;  %s1670_s21 = smov 56   ;;  %s1671_s25 = smov 64  }
 0x102   : > { %887 = vrot.lane.b32.xlu1 %v1830_v10, %s1667_s26  ;;  %767 = vrot.lane.b32.xlu0 %v1830_v10, %s1668_s27  ;;  %s1672_s26 = smov 40   ;;  %s1673_s27 = smov 48  }
 0x106   : > { %885 = vrot.lane.b32.xlu0 %v1830_v10, %s1669_s28  ;;  %s1674_s28 = smov 8  }
 0x16c   : > { %v537_v12 = vpop.permute.xlu0 %536  ;;  %v650_v15 = vpop.permute.xlu1 %649 }
 0x16d   : > { %v543_v13 = vsel %vm538_vm2, %v537_v12, 0 }
 0x16e   : > { %1437 = vmatpush3.bf16.xpose.msra.mxu1 %v543_v13 }
 0x16f   : > { %1448 = vmatprep.subr.bf16.mxu1 %v1661_v1 }
 0x170   : > { %v652_v14 = vpop.permute.xlu0 %651  ;;  %v770_v17 = vpop.permute.xlu1 %769 }
 0x171   : > { %v657_v16 = vsel %vm538_vm2, %v652_v14, 0  ;;  %v775_v18 = vsel %vm538_vm2, %v770_v17, 0 }
 0x174   : > { %v888_v19 = vpop.permute.xlu1 %887  ;;  %v768_v20 = vpop.permute.xlu0 %767 }
 0x175   : > { %1439 = vmatmul.mubr.msk.bf16.vlgmr.msra.gmra.mrb[0].mxu1 %vm538_vm2, %v1830_v10  ;;  %v893_v21 = vsel %vm538_vm2, %v888_v19, 0 }
 0x176   : > { %1449 = vmatpush3.bf16.xpose.msra.mxu1 %v657_v16  ;;  %1450 = vmatprep.mubr.msk.bf16.mxu1 %vm1662_vm0, %v1661_v1 }
 0x177   : > { %1460 = vmatprep.subr.bf16.mxu1 %v1661_v1 }
 0x178   : > { %v886_v22 = vpop.permute.xlu0 %885 }
 0x17d   : > { %1451 = vmatmul.mubr.msk.bf16.vlgmr.msra.gmra.mrb[4].mxu1 %vm538_vm2, %v650_v15 }
 0x17e   : > { %1461 = vmatpush3.bf16.xpose.msra.mxu1 %v775_v18  ;;  %1462 = vmatprep.mubr.msk.bf16.mxu1 %vm1662_vm0, %v1661_v1 }
 0x17f   : > { %1472 = vmatprep.subr.bf16.mxu1 %v1661_v1 }
 0x185   : > { %1463 = vmatmul.mubr.msk.bf16.vlgmr.msra.gmra.mrb[8].mxu1 %vm538_vm2, %v768_v20 }
 0x186   : > { %1473 = vmatpush3.bf16.xpose.msra.mxu1 %v893_v21  ;;  %1474 = vmatprep.mubr.msk.bf16.mxu1 %vm1662_vm0, %v1661_v1 }
 0x187   : > { %1484 = vmatprep.subr.bf16.mxu1 %v1661_v1 }
 0x18d   : > { %1475 = vmatmul.mubr.msk.bf16.vlgmr.msra.gmra.mrb[12].mxu1 %vm538_vm2, %v886_v22 }
 0x18e   : > { %1488 = vmatprep.mubr.msk.bf16.mxu1 %vm1662_vm0, %v1661_v1 }
 0x248   : > { %v579_v23 = vpop.f32.mrb[0].mxu1 }
 0x249   : > { %v585_v25 = vmul.f32 0.35355338, %v579_v23  ;;  %v1440_v26 = vpop.f32.mrb[1].mxu1 }
 0x24a   : > { %v582_v27 = vpop.f32.mrb[2].mxu1 }
 0x24b   : > { %v1441_v28 = vpop.f32.mrb[3].mxu1  ;;  %v586_v29 = vadd.f32 %v585_v25, %v465_v24 }
 0x24d   : > { %v587_v30 = vsel %vm538_vm2, %v586_v29, -inf }
 0x24e   : > { %588 = vmax.xlane.f32.xlu1 %v587_v30 }
 0x250   : > { %v693_v31 = vpop.f32.mrb[4].mxu1 }
 0x251   : > { %v699_v32 = vmul.f32 0.35355338, %v693_v31  ;;  %v1452_v33 = vpop.f32.mrb[5].mxu1 }
 0x252   : > { %v696_v34 = vpop.f32.mrb[6].mxu1 }
 0x253   : > { %v1453_v35 = vpop.f32.mrb[7].mxu1  ;;  %v700_v36 = vadd.f32 %v699_v32, %v465_v24 }
 0x255   : > { %v701_v37 = vsel %vm538_vm2, %v700_v36, -inf }
 0x256   : > { %702 = vmax.xlane.f32.xlu0 %v701_v37 }
 0x258   : > { %v811_v38 = vpop.f32.mrb[8].mxu1 }
 0x259   : > { %v817_v39 = vmul.f32 0.35355338, %v811_v38  ;;  %v1464_v40 = vpop.f32.mrb[9].mxu1 }
 0x25a   : > { %v814_v41 = vpop.f32.mrb[10].mxu1 }
 0x25b   : > { %v1465_v42 = vpop.f32.mrb[11].mxu1  ;;  %v818_v43 = vadd.f32 %v817_v39, %v465_v24 }
 0x25c   : > { %v1569_v42 = vld [vmem:[%s2030_s4] sm:$0xff]  }
 0x25d   : > { %v819_v44 = vsel %vm538_vm2, %v818_v43, -inf  ;;  %1485 = vmatpush3.bf16.msra.mxu1 %v1569_v42 }
 0x25e   : > { %820 = vmax.xlane.f32.xlu0 %v819_v44  ;;  %1486 = vmatprep.subr.bf16.mxu1 %v1661_v1 }
 0x260   : > { %v929_v45 = vpop.f32.mrb[12].mxu1 }
 0x261   : > { %v935_v46 = vmul.f32 0.35355338, %v929_v45  ;;  %v1476_v47 = vpop.f32.mrb[13].mxu1 }
 0x262   : > { %v932_v48 = vpop.f32.mrb[14].mxu1 }
 0x263   : > { %v1477_v49 = vpop.f32.mrb[15].mxu1  ;;  %v936_v50 = vadd.f32 %v935_v46, %v465_v24 }
 0x265   : > { %v937_v51 = vsel %vm538_vm2, %v936_v50, -inf }
 0x266   : > { %938 = vmax.xlane.f32.xlu1 %v937_v51 }
 0x2db   : > { %v589_v52 = vpop.xlane.xlu1 %588 }
 0x2dc   : > { %v590_v53 = vsub.f32 %v586_v29, %v589_v52 }
 0x2de   : > { %v591_v54 = vmul.f32 1.442695, %v590_v53 }
 0x2e0   : > { %1577 = vpow2.f32 %v591_v54 }
 0x2e3   : > { %v703_v55 = vpop.xlane.xlu0 %702 }
 0x2e4   : > { %v704_v56 = vsub.f32 %v700_v36, %v703_v55 }
 0x2e6   : > { %v705_v57 = vmul.f32 1.442695, %v704_v56 }
 0x2e8   : > { %1579 = vpow2.f32 %v705_v57  ;;  %v1376_v57 = vld [vmem:[%s2009_s5] ss:$0 sm:$0xff] }
 0x2ea   : > { %v1578_v58 = vpop.eup %1577 }
 0x2eb   : > { %v821_v59 = vpop.xlane.xlu0 %820  ;;  %v593_v60 = vsel %vm538_vm2, %v1578_v58, 0.0 }
 0x2ec   : > { %v822_v61 = vsub.f32 %v818_v43, %v821_v59  ;;  %594 = vadd.xlane.f32.xlu0 %v593_v60  ;;  %v1570_v43 = vld [vmem:[%s2030_s4 + $0x8] sm:$0xff]  }
 0x2ed   : > { %1487 = vmatpush3.bf16.msra.mxu1 %v1570_v43 }
 0x2ee   : > { %v823_v62 = vmul.f32 1.442695, %v822_v61  ;;  %1500 = vmatprep.subr.bf16.mxu1 %v1661_v1 }
 0x2f0   : > { %1581 = vpow2.f32 %v823_v62 }
 0x2f2   : > { %v1580_v63 = vpop.eup %1579 }
 0x2f3   : > { %v707_v0 = vsel %vm538_vm2, %v1580_v63, 0.0  ;;  %v939_v5 = vpop.xlane.xlu1 %938 }
 0x2f4   : > { %708 = vadd.xlane.f32.xlu1 %v707_v0  ;;  %v940_v6 = vsub.f32 %v936_v50, %v939_v5 }
 0x2f6   : > { %v941_v7 = vmul.f32 1.442695, %v940_v6 }
 0x2f8   : > { %1583 = vpow2.f32 %v941_v7 }
 0x2fa   : > { %v1582_v2 = vpop.eup %1581 }
 0x2fb   : > { %v825_v4 = vsel %vm538_vm2, %v1582_v2, 0.0 }
 0x2fc   : > { %826 = vadd.xlane.f32.xlu0 %v825_v4 }
 0x302   : > { %v1584_v8 = vpop.eup %1583 }
 0x303   : > { %v943_v9 = vsel %vm538_vm2, %v1584_v8, 0.0 }
 0x305   : > { %713 = vrot.lane.b32.xlu1 %v1830_v10, %s1670_s21 }
 0x312   : > { %599 = vrot.lane.b32.xlu0 %v1830_v10, %s1671_s25  ;;  %s1395_s25 = sshll.u32 %s1774_s17, 7  ;;  %s1677_s17 = smov [#allocation3]  }
 0x313   : > { %s1961_s4 = scalar_lea.hbm %s2018_s14, %s1395_s25 }
 0x316   : > { %949 = vrot.lane.b32.xlu0 %v1830_v10, %s1672_s26  ;;  %s1675_s26 = smov 16  }
 0x329   : > { %944 = vadd.xlane.f32.xlu1 %v943_v9  ;;  %v1573_v9 = vld [vmem:[%s2014_s10] sm:$0xff]  }
 0x33a   : > { %831 = vrot.lane.b32.xlu1 %v1830_v10, %s1673_s27  ;;  %s1676_s27 = smov 24  }
 0x379   : > { %v595_v11 = vpop.xlane.xlu0 %594 }
 0x37a   : > { %1585 = vrcp.f32 %v595_v11  ;;  %v1574_v11 = vld [vmem:[%s2014_s10 + $0x8] sm:$0xff]  }
 0x381   : > { %v709_v12 = vpop.xlane.xlu1 %708 }
 0x382   : > { %1587 = vrcp.f32 %v709_v12 }
 0x384   : > { %v1586_v13 = vpop.eup %1585 }
 0x385   : > { %v597_v15 = vmul.f32 %v1586_v13, %v1578_v58  ;;  %v714_v18 = vpop.permute.xlu1 %713 }
 0x386   : > { %v719_v21 = vsel %vm604_vm3, %v714_v18, 0  ;;  %v1381_v18 = vld [vmem:[%s2011_s7] ss:$0 sm:$0xff] }
 0x387   : > { %v598_v19 = vpack.c.bf16 %v597_v15, %v597_v15 }
 0x389   : > { %v827_v14 = vpop.xlane.xlu0 %826 }
 0x38a   : > { %1589 = vrcp.f32 %v827_v14 }
 0x38c   : > { %v1588_v20 = vpop.eup %1587 }
 0x38d   : > { %v600_v16 = vpop.permute.xlu0 %599  ;;  %v711_v10 = vmul.f32 %v1588_v20, %v1580_v63 }
 0x38e   : > { %v606_v17 = vsel %vm604_vm3, %v600_v16, 0  ;;  %v1380_v16 = vld [vmem:[%s2010_s6] ss:$0 sm:$0xff] }
 0x38f   : > { %1443 = vmatpush3.bf16.msra.mxu0 %v606_v17  ;;  %v712_v22 = vpack.c.bf16 %v711_v10, %v711_v10  ;;  %v1575_v10 = vld [vmem:[%s2014_s10 + $0x10] sm:$0xff]  }
 0x390   : > { %1454 = vmatprep.subr.bf16.mxu0 %v1661_v1 }
 0x391   : > { %v950_v28 = vpop.permute.xlu0 %949 }
 0x392   : > { %1445 = vmatmul.mubr.msk.bf16.vlgmr.msra.gmra.mrb[4].mxu0 %vm538_vm2, %v598_v19  ;;  %v955_v30 = vsel %vm604_vm3, %v950_v28, 0 }
 0x393   : > { %1455 = vmatpush3.bf16.msra.mxu0 %v719_v21  ;;  %1456 = vmatprep.mubr.msk.bf16.mxu0 %vm1662_vm0, %v1661_v1 }
 0x394   : > { %1466 = vmatprep.subr.bf16.mxu0 %v1661_v1  ;;  %v1590_v23 = vpop.eup %1589 }
 0x395   : > { %v829_v25 = vmul.f32 %v1590_v23, %v1582_v2  ;;  %v1382_v23 = vld [vmem:[%s2013_s9] ss:$0 sm:$0xff] }
 0x397   : > { %v830_v29 = vpack.c.bf16 %v829_v25, %v829_v25 }
 0x39a   : > { %1457 = vmatmul.mubr.msk.bf16.vlgmr.msra.gmra.mrb[8].mxu0 %vm538_vm2, %v712_v22  ;;  %v1576_v22 = vld [vmem:[%s2014_s10 + $0x18] sm:$0xff]  }
 0x39b   : > { %1468 = vmatprep.mubr.msk.bf16.mxu0 %vm1662_vm0, %v1661_v1 }
 0x3b6   : > { %v945_v24 = vpop.xlane.xlu1 %944 }
 0x3b7   : > { %1591 = vrcp.f32 %v945_v24 }
 0x3ba   : > { %v832_v26 = vpop.permute.xlu1 %831 }
 0x3bb   : > { %v837_v27 = vsel %vm604_vm3, %v832_v26, 0 }
 0x3bc   : > { %1467 = vmatpush3.bf16.msra.mxu0 %v837_v27 }
 0x3bd   : > { %1478 = vmatprep.subr.bf16.mxu0 %v1661_v1 }
 0x3bf   : > { %1469 = vmatmul.mubr.msk.bf16.vlgmr.msra.gmra.mrb[12].mxu0 %vm538_vm2, %v830_v29 }
 0x3c0   : > { %1479 = vmatpush3.bf16.msra.mxu0 %v955_v30  ;;  %1480 = vmatprep.mubr.msk.bf16.mxu0 %vm1662_vm0, %v1661_v1 }
 0x3c1   : > { %v1592_v31 = vpop.eup %1591  ;;  %1492 = vmatprep.subr.bf16.mxu0 %v1661_v1 }
 0x3c2   : > { %v947_v32 = vmul.f32 %v1592_v31, %v1584_v8  ;;  %v1571_v8 = vld [vmem:[%s2012_s8] sm:$0xff]  }
 0x3c4   : > { %v948_v33 = vpack.c.bf16 %v947_v32, %v947_v32 }
 0x3c7   : > { %1481 = vmatmul.mubr.msk.bf16.vlgmr.msra.gmra.mrb[16].mxu0 %vm538_vm2, %v948_v33 }
 0x3c8   : > { %1496 = vmatprep.mubr.msk.bf16.mxu0 %vm1662_vm0, %v1661_v1  ;;  %1493 = vmatpush3.bf16.msra.mxu0 %v1571_v8 }
 0x3c9   : > { %1494 = vmatprep.subr.bf16.mxu0 %v1661_v1 }
 0x465   : > { %v642_v34 = vpop.f32.mrb[4].mxu0 }
 0x466   : > { %648 = vst.msk [vmem:[#allocation2] sm:$0xff] %vm538_vm2, %v642_v34  ;;  %v1446_v35 = vpop.f32.mrb[5].mxu0 }
 0x467   : > { %v645_v36 = vpop.f32.mrb[6].mxu0 }
 0x468   : > { %v1447_v37 = vpop.f32.mrb[7].mxu0 }
 0x46d   : > { %v755_v38 = vpop.f32.mrb[8].mxu0 }
 0x46e   : > { %762 = vrot.lane.b32.xlu1 %v755_v38, %s1674_s28  ;;  %v1458_v39 = vpop.f32.mrb[9].mxu0  ;;  %s1286_s28 = scalar_lea.sflag [#allocation4], %s456_s0 }
 0x46f   : > { %v758_v40 = vpop.f32.mrb[10].mxu0 }
 0x470   : > { %v1459_v41 = vpop.f32.mrb[11].mxu0 }
 0x492   : > { %v873_v44 = vpop.f32.mrb[12].mxu0 }
 0x493   : > { %880 = vrot.lane.b32.xlu0 %v873_v44, %s1675_s26  ;;  %v1470_v45 = vpop.f32.mrb[13].mxu0 }
 0x494   : > { %v876_v46 = vpop.f32.mrb[14].mxu0 }
 0x495   : > { %v1471_v47 = vpop.f32.mrb[15].mxu0 }
 0x496   : > { %v1392_v47 = vld [vmem:[%s2016_s12] ss:$0 sm:$0xff] }
 0x49a   : > { %v991_v48 = vpop.f32.mrb[16].mxu0 }
 0x49b   : > { %998 = vrot.lane.b32.xlu1 %v991_v48, %s1676_s27  ;;  %v1482_v49 = vpop.f32.mrb[17].mxu0  ;;  %s1362_s27 = sshll.u32 %s456_s0, 3 }
 0x49c   : > { %v994_v50 = vpop.f32.mrb[18].mxu0  ;;  %v1393_v49 = vld [vmem:[%s2017_s13] ss:$0 sm:$0xff]  ;;  %s458_s26 = scalar_lea.vmem [#allocation3], %s1362_s27  ;;  %s1601_s27 = sshll.u32 %s1677_s17, 4  ;;  %s1602_s27 = int_to_ptr.vmem [resolvable:$false] %s1601_s27 }
 0x49d   : > { %v1483_v51 = vpop.f32.mrb[19].mxu0  ;;  %s1299_s1 = sshll.u32 %s458_s26, 4  ;;  %s1603_s20 = scalar_lea.vmem %s1602_s27, 256  ;;  %s1963_s1 = int_to_ptr.vmem [resolvable:$true] %s1299_s1 }
 0x49e   : > { %s1597_s18 = scalar_lea.vmem %s1963_s1, 128  ;;  %p1604_p0 = scmp.lt.s32.totalorder %s1963_s1, %s1602_s27 }
 0x49f   : > { %p1598_p11 = scmp.ne.s32.totalorder %s1963_s1, %s1597_s18  ;;  %p1605_p1 = scmp.lt.s32.totalorder %s1603_s20, %s1597_s18 }
 0x4a1   : > { %p1599_p12 = pnand %p1598_p11, %p1791_p5  ;;  %p1606_p2 = por %p1605_p1, %p1604_p0 }
 0x4a3   : > { %p1600_p13 = pneg %p1599_p12 }
 0x4a5   : > { %p1607_p3 = pnand %p1606_p2, %p1600_p13 }
 0x4e0   : > { %v763_v52 = vpop.permute.xlu1 %762 }
 0x4e1   : > { %766 = vst.msk [vmem:[#allocation2] sm:$0xff] %vm765_vm4, %v763_v52 }
 0x505   : > { %v881_v53 = vpop.permute.xlu0 %880 }
 0x506   : > { %884 = vst.msk [vmem:[#allocation2] sm:$0xff] %vm883_vm5, %v881_v53 }
 0x50d   : > { %v999_v54 = vpop.permute.xlu1 %998 }
 0x50e   : > { %1002 = vst.msk [vmem:[#allocation2] sm:$0xff] %vm1001_vm6, %v999_v54 }
 0x515   : > { %v1003_v55 = vld [vmem:[#allocation2] sm:$0xff] }
 0x516   : > { %v1004_v56 = vpack.c.bf16 %v1003_v55, %v1003_v55 }
 0x518   : > { %1489 = vmatmul.mubr.msk.bf16.vlgmr.msra.gmra.mrb[16].mxu1 %vm490_vm1, %v1004_v56 }
 0x519   : > { %1508 = vmatprep.mubr.msk.bf16.mxu1 %vm1662_vm0, %v1661_v1  ;;  %1501 = vmatpush3.bf16.msra.mxu1 %v1573_v9 }
 0x51a   : > { %1502 = vmatprep.subr.bf16.mxu1 %v1661_v1 }
 0x51d   : > { %1503 = vmatpush3.bf16.msra.mxu1 %v1574_v11 }
 0x51e   : > { %1504 = vmatprep.subr.bf16.mxu1 %v1661_v1 }
 0x521   : > { %1505 = vmatpush3.bf16.msra.mxu1 %v1575_v10 }
 0x522   : > { %1506 = vmatprep.subr.bf16.mxu1 %v1661_v1  ;;  %v1386_v1 = vld [vmem:[%s2015_s11] ss:$0 sm:$0xff] }
 0x525   : > { %1507 = vmatpush3.bf16.msra.mxu1 %v1576_v22 }
 0x5eb   : > { %v1065_v58 = vpop.f32.mrb[16].mxu1 }
 0x5ec   : > { %v1066_v59 = vadd.f32 %v1376_v57, %v1065_v58  ;;  %v1490_v60 = vpop.f32.mrb[17].mxu1 }
 0x5ed   : > { %v1068_v61 = vpop.f32.mrb[18].mxu1 }
 0x5ee   : > { %v1491_v62 = vpop.f32.mrb[19].mxu1  ;;  %v1071_v63 = vadd.f32 %v1066_v59, %v1820_v3  ;;  %v1572_v3 = vld [vmem:[%s2012_s8 + $0x8] sm:$0xff]  }
 0x5ef   : > { %1495 = vmatpush3.bf16.msra.mxu0 %v1572_v3 }
 0x5f0   : > { %v1074_v0 = vsel %vm490_vm1, %v1071_v63, 0.0 }
 0x5f1   : > { %1075 = vadd.xlane.f32.xlu0 %v1074_v0 }
 0x67e   : > { %v1076_v2 = vpop.xlane.xlu0 %1075 }
 0x67f   : > { %v1078_v4 = vmul.f32 0.03125, %v1076_v2 }
 0x681   : > { %v1079_v5 = vsub.f32 %v1071_v63, %v1078_v4 }
 0x683   : > { %v1080_v6 = vmul.f32 %v1079_v5, %v1079_v5 }
 0x685   : > { %v1081_v7 = vsel %vm490_vm1, %v1080_v6, 0.0 }
 0x686   : > { %1082 = vadd.xlane.f32.xlu1 %v1081_v7 }
 0x713   : > { %v1083_v12 = vpop.xlane.xlu1 %1082 }
 0x714   : > { %v1084_v13 = vmul.f32 0.03125, %v1083_v12 }
 0x716   : > { %v1085_v14 = vadd.f32 1e-05, %v1084_v13 }
 0x718   : > { %1593 = vrsqrt.f32 %v1085_v14 }
 0x722   : > { %v1594_v15 = vpop.eup %1593 }
 0x723   : > { %v1087_v17 = vmul.f32 %v1594_v15, %v1079_v5 }
 0x725   : > { %v1094_v19 = vmul.f32 %v1380_v16, %v1087_v17 }
 0x727   : > { %v1101_v20 = vadd.f32 %v1381_v18, %v1094_v19 }
 0x729   : > { %v1102_v21 = vpack.c.bf16 %v1101_v20, %v1101_v20 }
 0x72b   : > { %1497 = vmatmul.mubr.msk.bf16.vlgmr.msra.gmra.mrb[20].mxu0 %vm490_vm1, %v1102_v21 }
 0x7fe   : > { %v1163_v24 = vpop.f32.mrb[20].mxu0 }
 0x7ff   : > { %v1164_v25 = vadd.f32 %v1382_v23, %v1163_v24  ;;  %v1498_v26 = vpop.f32.mrb[21].mxu0 }
 0x800   : > { %v1166_v27 = vpop.f32.mrb[22].mxu0 }
 0x801   : > { %v1169_v28 = vmax.f32 %v1164_v25, 0.0  ;;  %v1499_v29 = vpop.f32.mrb[23].mxu0 }
 0x803   : > { %v1170_v30 = vpack.c.bf16 %v1169_v28, %v1169_v28 }
 0x805   : > { %1509 = vmatmul.mubr.msk.bf16.vlgmr.msra.gmra.mrb[20].mxu1 %vm1210_vm7, %v1170_v30 }
 0x8d8   : > { %v1248_v31 = vpop.f32.mrb[20].mxu1 }
 0x8d9   : > { %v1249_v32 = vadd.f32 %v1386_v1, %v1248_v31  ;;  %v1510_v33 = vpop.f32.mrb[21].mxu1 }
 0x8da   : > { %v1251_v34 = vpop.f32.mrb[22].mxu1 }
 0x8db   : > { %v1511_v35 = vpop.f32.mrb[23].mxu1  ;;  %v1254_v36 = vadd.f32 %v1249_v32, %v1101_v20 }
 0x8dd   : > { %v1257_v37 = vsel %vm490_vm1, %v1254_v36, 0.0 }
 0x8de   : > { %1258 = vadd.xlane.f32.xlu0 %v1257_v37 }
 0x96b   : > { %v1259_v38 = vpop.xlane.xlu0 %1258 }
 0x96c   : > { %v1260_v39 = vmul.f32 0.03125, %v1259_v38 }
 0x96e   : > { %v1261_v40 = vsub.f32 %v1254_v36, %v1260_v39 }
 0x970   : > { %v1262_v41 = vmul.f32 %v1261_v40, %v1261_v40 }
 0x972   : > { %v1263_v42 = vsel %vm490_vm1, %v1262_v41, 0.0 }
 0x973   : > { %1264 = vadd.xlane.f32.xlu0 %v1263_v42 }
 0xa00   : > { %v1265_v43 = vpop.xlane.xlu0 %1264 }
 0xa01   : > { %v1266_v44 = vmul.f32 0.03125, %v1265_v43 }
 0xa03   : > { %v1267_v45 = vadd.f32 1e-05, %v1266_v44 }
 0xa05   : > { %1595 = vrsqrt.f32 %v1267_v45 }
 0xa0f   : > { %v1596_v46 = vpop.eup %1595 }
 0xa10   : > { %v1269_v48 = vmul.f32 %v1596_v46, %v1261_v40 }
 0xa12   : > { %v1276_v50 = vmul.f32 %v1392_v47, %v1269_v48 }
 0xa14   : > { %v1283_v51 = vadd.f32 %v1393_v49, %v1276_v50 }
 0xa16   : > { %1284 = vst.msk [vmem:[%s458_s26] sm:$0xff] %vm490_vm1, %v1283_v51 }
 0xa17   : > { %1610 = shalt.err (!%p1607_p3)
}
 0xa18   : > { %s1611_s2 = scalar_lea.hbm %s1961_s4, 128  ;;  %s1615_s21 = scalar_lea.hbm %s2018_s14, 256 }
 0xa19   : > { %p1612_p4 = scmp.ne.s32.totalorder %s1961_s4, %s1611_s2  ;;  %p1616_p9 = scmp.lt.u32.totalorder %s1961_s4, %s2018_s14 }
 0xa1a   : > { %p1617_p10 = scmp.lt.u32.totalorder %s1615_s21, %s1611_s2  ;;  %p1619_p12 = scmp.lt.u32.totalorder %s1611_s2, %s1961_s4 }
 0xa1b   : > { %p1613_p7 = pnand %p1612_p4, %p1791_p5 }
 0xa1c   : > { %p1618_p11 = por %p1617_p10, %p1616_p9 }
 0xa1d   : > { %p1614_p8 = pneg %p1613_p7 }
 0xa1e   : > { %p1620_p13 = por %p1619_p12, %p1618_p11 }
 0xa20   : > { %p1621_p0 = pnand %p1620_p13, %p1614_p8 }
 0xa22   : > { %1624 = shalt.err (!%p1621_p0)
}
 0xa23   : > { %1512 = dma.vmem_to_hbm [thread:$0]  (%p1791_p5), %s1963_s1, 128, %s1961_s4, %s1286_s28  }
 0xa24 PF: > { %p1518_p1 = scmp.ge.s32.totalorder %s1659_s16, 2  ;;  %s1311_s18 = sand.u32 1, %s1647_s29  }
 0xa25   : > { %s1312_s17 = scalar_lea.sflag [#allocation4], %s1311_s18 }
 0xa26   : > { %p1515_p2 = pnand %p1518_p1, %p1795_p6 }
 0xa28   : > { %1642 = dma.done.wait (!%p1515_p2), %s1312_s17, 128  }
 0xa29   : > { %1644 = vsyncadd (!%p1515_p2), %s1312_s17, 4294967168  ;;  %p24_p3 = scmp.ge.s32.totalorder %s1778_s19, 4   ;;  %s2031_s29 = smov %s1651_s30 }
 0xa2a   : > { %s2032_s30 = smov %s1655_s15  ;;  %s2033_s15 = smov %s1789_s22 }
 0xa2b   : > { %s2034_s16 = smov %s1778_s19  ;;  %26 = sbr.rel (!%p24_p3) target bundleno = 9 (0x9), region = 111 }
 0xa32   :  { %1317 = vsyncpa [#allocation4], 1 }
 0xa33   :  { %1319 = vsyncpa [#allocation4 + $0x1], 1 }

// kernel: proposed_encoder_forward.2
= control target key start
LH: loop header
LB: loop body
LE: loop exit
PB: predicated region body
PF: predicated region fallthrough
CT: control target
= control target key end

     0   :  { %s2116_s0 = inlined_call_operand.vmem [shape: f32[2,8,32], index: 0, kind: input, shape index: {}]   ;;  %s2117_s1 = inlined_call_operand.vmem [shape: f32[8,8], index: 1, kind: input, shape index: {}]   ;;  %s2118_s2 = inlined_call_operand.vmem [shape: bf16[32,96], index: 2, kind: input, shape index: {}]   ;;  %s2119_s3 = inlined_call_operand.vmem [shape: f32[1,96], index: 3, kind: input, shape index: {}]   ;;  %s2120_s4 = inlined_call_operand.vmem [shape: bf16[32,32], index: 4, kind: input, shape index: {}]   ;;  %s2121_s5 = inlined_call_operand.vmem [shape: f32[1,32], index: 5, kind: input, shape index: {}]   ;;  %s2122_s6 = inlined_call_operand.vmem [shape: f32[1,32], index: 6, kind: input, shape index: {}]   ;;  %s2123_s7 = inlined_call_operand.vmem [shape: f32[1,32], index: 7, kind: input, shape index: {}]   ;;  %s2124_s8 = inlined_call_operand.hbm [shape: bf16[32,64], index: 8, kind: input, shape index: {}]   ;;  %s2125_s9 = inlined_call_operand.hbm [shape: f32[1,64], index: 9, kind: input, shape index: {}]   ;;  %s2126_s10 = inlined_call_operand.vmem [shape: bf16[64,32], index: 10, kind: input, shape index: {}]   ;;  %s2127_s11 = inlined_call_operand.hbm [shape: f32[1,32], index: 11, kind: input, shape index: {}]   ;;  %s2128_s12 = inlined_call_operand.vmem [shape: f32[1,32], index: 12, kind: input, shape index: {}]   ;;  %s2129_s13 = inlined_call_operand.vmem [shape: f32[1,32], index: 13, kind: input, shape index: {}]   ;;  %s2130_s14 = inlined_call_operand.vmem [shape: f32[2,8,32], index: 14, kind: output, shape index: {}]  }
   0x1   :  { %2134 = sst [smem:[#allocation11_spill]] %s2125_s9 }
   0x2   :  { %19 = vsyncpa [#allocation4], 0 }
   0x3   :  { %20 = vsyncpa [#allocation6], 0  ;;  %s1851_s29 = smov 0  }
   0x4 LB: > { %2135 = sst [smem:[#allocation10_spill]] %s1753_s29  ;;  %s1755_s30 = smov [#allocation5]   ;;  %s1753_s29 = sphi %s1851_s29, %s26_s29  }
   0x5   : > { %s403_s15 = sshll.u32 %s1755_s30, 4  ;;  %s1857_s16 = sadd.s32 4294967295, %s1753_s29   ;;  %s404_s15 = int_to_ptr.vmem [resolvable:$true] %s403_s15 }
   0x6   : > { %p1411_p0 = scmp.ge.s32.totalorder %s1753_s29, 1  ;;  %p356_p1 = scmp.lt.s32.totalorder %s1753_s29, 3 }
   0x7   : > { %p2131_p2 = scmp.eq.s32.totalorder %s1857_s16, 0  ;;  %s1756_s18 = smov [#allocation3]  }
   0x8   : > { %p1862_p3 = pnand %p1411_p0, %p356_p1  ;;  %s389_s19 = sshll.u32 %s1756_s18, 4  ;;  %s1874_s19 = int_to_ptr.vmem [resolvable:$true] %s389_s19 }
   0x9   : > { %s1757_s21 = smov [#allocation7]   ;;  %s2138_s9 = sld [smem:[#allocation11_spill]] }
   0xa   : > { %s2136_s17 = scalar_select %p1862_p3, 1, 0 }
   0xb   : > { %p1580_p4 = pneg %p1862_p3  ;;  %s417_s22 = sshll.u32 %s1757_s21, 4  ;;  %s1876_s22 = int_to_ptr.vmem [resolvable:$true] %s417_s22 }
   0xd   : > { %p1870_p5 = pnand %p2131_p2, %p1580_p4 }
   0xf   : > { %s1655_s25 = scalar_lea.hbm %s2138_s9, 16  ;;  %p1886_p7 = pneg %p1870_p5 }
  0x10   : > { %p1656_p6 = scmp.ne.s32.totalorder %s2138_s9, %s1655_s25  ;;  %p1662_p10 = scmp.lt.u32.totalorder %s1655_s25, %s2138_s9 }
  0x12   : > { %p1658_p8 = pnand %p1886_p7, %p1656_p6 }
  0x14   : > { %p1659_p9 = pneg %p1658_p8 }
  0x16   : > { %p1664_p11 = pnand %p1662_p10, %p1659_p9 }
  0x18   : > { %1667 = shalt.err (!%p1664_p11)
}
  0x19   : > { %s1668_s21 = scalar_lea.vmem %s404_s15, 16  ;;  %s1675_s23 = scalar_lea.vmem %s404_s15, 32 }
  0x1a   : > { %p1669_p12 = scmp.ne.s32.totalorder %s404_s15, %s1668_s21  ;;  %p1676_p1 = scmp.lt.s32.totalorder %s404_s15, %s404_s15 }
  0x1b   : > { %p1677_p4 = scmp.lt.s32.totalorder %s1675_s23, %s1668_s21 }
  0x1c   : > { %p1671_p13 = pnand %p1669_p12, %p1886_p7 }
  0x1d   : > { %p1678_p2 = por %p1677_p4, %p1676_p1 }
  0x1e   : > { %p1672_p0 = pneg %p1671_p13 }
  0x20   : > { %p1679_p3 = pnand %p1678_p2, %p1672_p0 }
  0x22   : > { %1682 = shalt.err (!%p1679_p3)
}
  0x23   : > { %1586 = dma.hbm_to_vmem [thread:$0]  (!%p1870_p5), %s2138_s9, 16, %s404_s15, [#allocation6]  }
  0x24   : > { %s1683_s30 = scalar_lea.hbm %s2124_s8, 256 }
  0x25   : > { %p1684_p6 = scmp.ne.s32.totalorder %s2124_s8, %s1683_s30  ;;  %p1690_p2 = scmp.lt.u32.totalorder %s1683_s30, %s2124_s8 }
  0x27   : > { %p1686_p8 = pnand %p1684_p6, %p1886_p7 }
  0x29   : > { %p1687_p9 = pneg %p1686_p8 }
  0x2b   : > { %p1692_p3 = pnand %p1690_p2, %p1687_p9 }
  0x2d   : > { %1695 = shalt.err (!%p1692_p3)
}
  0x2e   : > { %s1696_s15 = scalar_lea.vmem %s1874_s19, 256  ;;  %p1704_p13 = scmp.lt.s32.totalorder %s1874_s19, %s1874_s19 }
  0x2f   : > { %p1697_p10 = scmp.ne.s32.totalorder %s1874_s19, %s1696_s15  ;;  %p1705_p0 = scmp.lt.s32.totalorder %s1696_s15, %s1696_s15 }
  0x31   : > { %p1699_p11 = pnand %p1697_p10, %p1886_p7  ;;  %p1706_p1 = por %p1705_p0, %p1704_p13 }
  0x33   : > { %p1700_p12 = pneg %p1699_p11 }
  0x35   : > { %p1707_p4 = pnand %p1706_p1, %p1700_p12 }
  0x37   : > { %1710 = shalt.err (!%p1707_p4)
}
  0x38   : > { %s1758_s29 = smov 64   ;;  %s1759_s24 = smov 4  }
  0x39   : > { %1583 = dma.hbm_to_vmem [thread:$0]  (!%p1870_p5), %s2124_s8, 256, %s1874_s19, [#allocation4], %s1758_s29, %s1758_s29, %s1759_s24  }
  0x3a   : > { %s1711_s18 = scalar_lea.hbm %s2127_s11, 16 }
  0x3b   : > { %p1712_p6 = scmp.ne.s32.totalorder %s2127_s11, %s1711_s18  ;;  %p1718_p2 = scmp.lt.u32.totalorder %s1711_s18, %s2127_s11 }
  0x3d   : > { %p1714_p8 = pnand %p1712_p6, %p1886_p7 }
  0x3f   : > { %p1715_p9 = pneg %p1714_p8 }
  0x41   : > { %p1720_p3 = pnand %p1718_p2, %p1715_p9 }
  0x43   : > { %1723 = shalt.err (!%p1720_p3)
}
  0x44   : > { %s1724_s19 = scalar_lea.vmem %s1876_s22, 16  ;;  %s1731_s29 = scalar_lea.vmem %s1876_s22, 32 }
  0x45   : > { %p1725_p10 = scmp.ne.s32.totalorder %s1876_s22, %s1724_s19  ;;  %p1732_p13 = scmp.lt.s32.totalorder %s1876_s22, %s1876_s22 }
  0x46   : > { %p1733_p0 = scmp.lt.s32.totalorder %s1731_s29, %s1724_s19 }
  0x47   : > { %p1727_p11 = pnand %p1725_p10, %p1886_p7 }
  0x48   : > { %p1734_p1 = por %p1733_p0, %p1732_p13 }
  0x49   : > { %p1728_p12 = pneg %p1727_p11 }
  0x4b   : > { %p1735_p4 = pnand %p1734_p1, %p1728_p12 }
  0x4d   : > { %1738 = shalt.err (!%p1735_p4)
}
  0x4e   : > { %1589 = dma.hbm_to_vmem [thread:$0]  (!%p1870_p5), %s2127_s11, 16, %s1876_s22, [#allocation6]  }
  0x4f   : > { %p2140_p6 = scmp.ne.s32.totalorder %s2136_s17, 0 }
  0x50   : > { %p2141_p7 = scmp.eq.s32.totalorder (!%p2140_p6), %s1857_s16, 0 }
  0x51   : > { %443 = sbr.rel (%p2140_p6) target bundleno = 2651 (0xa5b), region = 76 }
  0x58   : > { %1744 = dma.done.wait (%p2141_p7), [#allocation4], 256   ;;  %p2142_p8 = pmov %p2141_p7 }
  0x59   : > { %p2143_p9 = pmov %p2141_p7 }
  0x5a   : > { %1746 = vsyncadd (%p2142_p8), [#allocation4], 4294967040 }
  0x5b   : > { %1748 = dma.done.wait (%p2143_p9), [#allocation6], 32   ;;  %p2144_p2 = pmov %p2141_p7 }
  0x5c   : > { %p495_p3 = scmp.lt.s32.totalorder %s1857_s16, 1  ;;  %v1760_v0 = vmov 0.0   ;;  %vm1761_vm0 = vmmov 0   ;;  %v1625_v1 = vld [vmem:[%s2118_s2] sm:$0xff]   ;;  %v1626_v2 = vld [vmem:[%s2118_s2 + $0x8] sm:$0xff]   ;;  %vm530_vm1 = vcmask 261120  }
  0x5d   : > { %1750 = vsyncadd (%p2144_p2), [#allocation6], 4294967264  ;;  %1484 = vmatprep.subr.bf16.mxu0 %v1760_v0  ;;  %1488 = vmatprep.mubr.msk.bf16.mxu0 %vm1761_vm0, %v1760_v0  ;;  %v1422_v5 = vld [vmem:[%s2119_s3] ss:$0 sm:$0xff]  ;;  %s1762_s23 = smov 120   ;;  %s1763_s15 = smov 96  }
  0x5e   : > { %s2147_s16 = smov (!%p495_p3, %s1857_s16), 1  ;;  %1492 = vmatprep.subr.bf16.mxu1 %v1760_v0  ;;  %1494 = vmatprep.mubr.msk.bf16.mxu1 %vm1761_vm0, %v1760_v0  ;;  %s1764_s19 = smov 80   ;;  %vm578_vm2 = vcmask 64512   ;;  %v505_v24 = vld [vmem:[%s2117_s1] sm:$0xff]  ;;  %vm644_vm3 = vcmask 1043456   ;;  %vm805_vm4 = vcmask 130112  }
  0x5f   : > { %s1420_s17 = sshll.u32 %s2147_s16, 3  ;;  %1485 = vmatpush3.bf16.msra.mxu0 %v1625_v1  ;;  %s1765_s29 = smov 88   ;;  %vm923_vm5 = vcmask 195712   ;;  %vm1041_vm6 = vcmask 261312   ;;  %vm1250_vm7 = vcmask 523264  }
  0x60   : > { %s498_s28 = scalar_lea.vmem %s2116_s0, %s1420_s17  ;;  %1486 = vmatprep.subr.bf16.mxu0 %v1760_v0  ;;  %s1766_s9 = smov 72  }
  0x61   : > { %v1981_v3 = vld [vmem:[%s498_s28] sm:$0xff]  ;;  %s1767_s24 = smov 112   ;;  %s1768_s20 = smov 104  }
  0x62   : > { %v506_v4 = vpack.c.bf16 %v1981_v3, %v1981_v3  ;;  %s1769_s26 = smov 56   ;;  %s1770_s25 = smov 64  }
  0x63   : > { %1487 = vmatpush3.bf16.msra.mxu0 %v1626_v2  ;;  %s1771_s27 = smov 40   ;;  %s1772_s30 = smov 48  }
  0x64   : > { %1498 = vmatprep.subr.bf16.mxu0 %v1760_v0  ;;  %s1773_s18 = smov 8  }
  0x66   : > { %1489 = vmatmul.mubr.msk.bf16.vlgmr.msra.gmra.mrb[0].mxu0 %vm530_vm1, %v506_v4 }
  0x67   : > { %1500 = vmatprep.mubr.msk.bf16.mxu0 %vm1761_vm0, %v1760_v0 }
 0x139   : > { %v568_v6 = vpop.f32.mrb[0].mxu0 }
 0x13a   : > { %v569_v7 = vadd.f32 %v1422_v5, %v568_v6  ;;  %v1490_v8 = vpop.f32.mrb[1].mxu0 }
 0x13b   : > { %v571_v9 = vpop.f32.mrb[2].mxu0 }
 0x13c   : > { %v1993_v10 = vpack.c.bf16 %v569_v7, %v569_v7  ;;  %v1491_v11 = vpop.f32.mrb[3].mxu0 }
 0x13e   : > { %689 = vrot.lane.b32.xlu1 %v1993_v10, %s1762_s23  ;;  %576 = vrot.lane.b32.xlu0 %v1993_v10, %s1763_s15 }
 0x142   : > { %809 = vrot.lane.b32.xlu1 %v1993_v10, %s1764_s19  ;;  %691 = vrot.lane.b32.xlu0 %v1993_v10, %s1765_s29  ;;  %s1774_s29 = smov 16  }
 0x146   : > { %927 = vrot.lane.b32.xlu1 %v1993_v10, %s1766_s9  ;;  %807 = vrot.lane.b32.xlu0 %v1993_v10, %s1767_s24  ;;  %s1775_s9 = smov 24  }
 0x14a   : > { %925 = vrot.lane.b32.xlu0 %v1993_v10, %s1768_s20 }
 0x1b0   : > { %v577_v12 = vpop.permute.xlu0 %576  ;;  %v690_v15 = vpop.permute.xlu1 %689 }
 0x1b1   : > { %v583_v13 = vsel %vm578_vm2, %v577_v12, 0 }
 0x1b2   : > { %1493 = vmatpush3.bf16.xpose.msra.mxu1 %v583_v13 }
 0x1b3   : > { %1504 = vmatprep.subr.bf16.mxu1 %v1760_v0 }
 0x1b4   : > { %v692_v14 = vpop.permute.xlu0 %691  ;;  %v810_v17 = vpop.permute.xlu1 %809 }
 0x1b5   : > { %v697_v16 = vsel %vm578_vm2, %v692_v14, 0  ;;  %v815_v18 = vsel %vm578_vm2, %v810_v17, 0 }
 0x1b8   : > { %v928_v19 = vpop.permute.xlu1 %927  ;;  %v808_v20 = vpop.permute.xlu0 %807 }
 0x1b9   : > { %1495 = vmatmul.mubr.msk.bf16.vlgmr.msra.gmra.mrb[0].mxu1 %vm578_vm2, %v1993_v10  ;;  %v933_v21 = vsel %vm578_vm2, %v928_v19, 0 }
 0x1ba   : > { %1505 = vmatpush3.bf16.xpose.msra.mxu1 %v697_v16  ;;  %1506 = vmatprep.mubr.msk.bf16.mxu1 %vm1761_vm0, %v1760_v0 }
 0x1bb   : > { %1516 = vmatprep.subr.bf16.mxu1 %v1760_v0 }
 0x1bc   : > { %v926_v22 = vpop.permute.xlu0 %925 }
 0x1c1   : > { %1507 = vmatmul.mubr.msk.bf16.vlgmr.msra.gmra.mrb[4].mxu1 %vm578_vm2, %v690_v15 }
 0x1c2   : > { %1517 = vmatpush3.bf16.xpose.msra.mxu1 %v815_v18  ;;  %1518 = vmatprep.mubr.msk.bf16.mxu1 %vm1761_vm0, %v1760_v0 }
 0x1c3   : > { %1528 = vmatprep.subr.bf16.mxu1 %v1760_v0 }
 0x1c9   : > { %1519 = vmatmul.mubr.msk.bf16.vlgmr.msra.gmra.mrb[8].mxu1 %vm578_vm2, %v808_v20 }
 0x1ca   : > { %1529 = vmatpush3.bf16.xpose.msra.mxu1 %v933_v21  ;;  %1530 = vmatprep.mubr.msk.bf16.mxu1 %vm1761_vm0, %v1760_v0 }
 0x1cb   : > { %1540 = vmatprep.subr.bf16.mxu1 %v1760_v0 }
 0x1d1   : > { %1531 = vmatmul.mubr.msk.bf16.vlgmr.msra.gmra.mrb[12].mxu1 %vm578_vm2, %v926_v22 }
 0x1d2   : > { %1544 = vmatprep.mubr.msk.bf16.mxu1 %vm1761_vm0, %v1760_v0 }
 0x28c   : > { %v619_v23 = vpop.f32.mrb[0].mxu1 }
 0x28d   : > { %v625_v25 = vmul.f32 0.35355338, %v619_v23  ;;  %v1496_v26 = vpop.f32.mrb[1].mxu1 }
 0x28e   : > { %v622_v27 = vpop.f32.mrb[2].mxu1 }
 0x28f   : > { %v1497_v28 = vpop.f32.mrb[3].mxu1  ;;  %v626_v29 = vadd.f32 %v625_v25, %v505_v24 }
 0x291   : > { %v627_v30 = vsel %vm578_vm2, %v626_v29, -inf }
 0x292   : > { %628 = vmax.xlane.f32.xlu1 %v627_v30 }
 0x294   : > { %v733_v31 = vpop.f32.mrb[4].mxu1 }
 0x295   : > { %v739_v32 = vmul.f32 0.35355338, %v733_v31  ;;  %v1508_v33 = vpop.f32.mrb[5].mxu1 }
 0x296   : > { %v736_v34 = vpop.f32.mrb[6].mxu1 }
 0x297   : > { %v1509_v35 = vpop.f32.mrb[7].mxu1  ;;  %v740_v36 = vadd.f32 %v739_v32, %v505_v24 }
 0x299   : > { %v741_v37 = vsel %vm578_vm2, %v740_v36, -inf }
 0x29a   : > { %742 = vmax.xlane.f32.xlu0 %v741_v37 }
 0x29c   : > { %v851_v38 = vpop.f32.mrb[8].mxu1 }
 0x29d   : > { %v857_v39 = vmul.f32 0.35355338, %v851_v38  ;;  %v1520_v40 = vpop.f32.mrb[9].mxu1 }
 0x29e   : > { %v854_v41 = vpop.f32.mrb[10].mxu1 }
 0x29f   : > { %v1521_v42 = vpop.f32.mrb[11].mxu1  ;;  %v858_v43 = vadd.f32 %v857_v39, %v505_v24 }
 0x2a0   : > { %v1627_v42 = vld [vmem:[%s2120_s4] sm:$0xff]  }
 0x2a1   : > { %v859_v44 = vsel %vm578_vm2, %v858_v43, -inf  ;;  %1541 = vmatpush3.bf16.msra.mxu1 %v1627_v42 }
 0x2a2   : > { %860 = vmax.xlane.f32.xlu0 %v859_v44  ;;  %1542 = vmatprep.subr.bf16.mxu1 %v1760_v0 }
 0x2a4   : > { %v969_v45 = vpop.f32.mrb[12].mxu1 }
 0x2a5   : > { %v975_v46 = vmul.f32 0.35355338, %v969_v45  ;;  %v1532_v47 = vpop.f32.mrb[13].mxu1 }
 0x2a6   : > { %v972_v48 = vpop.f32.mrb[14].mxu1 }
 0x2a7   : > { %v1533_v49 = vpop.f32.mrb[15].mxu1  ;;  %v976_v50 = vadd.f32 %v975_v46, %v505_v24 }
 0x2a9   : > { %v977_v51 = vsel %vm578_vm2, %v976_v50, -inf }
 0x2aa   : > { %978 = vmax.xlane.f32.xlu1 %v977_v51 }
 0x31f   : > { %v629_v52 = vpop.xlane.xlu1 %628 }
 0x320   : > { %v630_v53 = vsub.f32 %v626_v29, %v629_v52 }
 0x322   : > { %v631_v54 = vmul.f32 1.442695, %v630_v53 }
 0x324   : > { %1635 = vpow2.f32 %v631_v54 }
 0x327   : > { %v743_v55 = vpop.xlane.xlu0 %742 }
 0x328   : > { %v744_v56 = vsub.f32 %v740_v36, %v743_v55 }
 0x32a   : > { %v745_v57 = vmul.f32 1.442695, %v744_v56 }
 0x32c   : > { %1637 = vpow2.f32 %v745_v57  ;;  %v1434_v57 = vld [vmem:[%s2121_s5] ss:$0 sm:$0xff] }
 0x32e   : > { %v1636_v58 = vpop.eup %1635 }
 0x32f   : > { %v861_v59 = vpop.xlane.xlu0 %860  ;;  %v633_v60 = vsel %vm578_vm2, %v1636_v58, 0.0 }
 0x330   : > { %v862_v61 = vsub.f32 %v858_v43, %v861_v59  ;;  %634 = vadd.xlane.f32.xlu0 %v633_v60  ;;  %v1628_v43 = vld [vmem:[%s2120_s4 + $0x8] sm:$0xff]  }
 0x331   : > { %1543 = vmatpush3.bf16.msra.mxu1 %v1628_v43 }
 0x332   : > { %v863_v62 = vmul.f32 1.442695, %v862_v61  ;;  %1556 = vmatprep.subr.bf16.mxu1 %v1760_v0 }
 0x334   : > { %1639 = vpow2.f32 %v863_v62 }
 0x336   : > { %v1638_v63 = vpop.eup %1637 }
 0x337   : > { %v747_v1 = vsel %vm578_vm2, %v1638_v63, 0.0  ;;  %v979_v5 = vpop.xlane.xlu1 %978 }
 0x338   : > { %748 = vadd.xlane.f32.xlu1 %v747_v1  ;;  %v980_v6 = vsub.f32 %v976_v50, %v979_v5 }
 0x33a   : > { %v981_v7 = vmul.f32 1.442695, %v980_v6 }
 0x33c   : > { %1641 = vpow2.f32 %v981_v7 }
 0x33e   : > { %v1640_v2 = vpop.eup %1639 }
 0x33f   : > { %v865_v4 = vsel %vm578_vm2, %v1640_v2, 0.0 }
 0x340   : > { %866 = vadd.xlane.f32.xlu0 %v865_v4 }
 0x346   : > { %v1642_v8 = vpop.eup %1641 }
 0x347   : > { %v983_v9 = vsel %vm578_vm2, %v1642_v8, 0.0 }
 0x349   : > { %753 = vrot.lane.b32.xlu1 %v1993_v10, %s1769_s26 }
 0x356   : > { %639 = vrot.lane.b32.xlu0 %v1993_v10, %s1770_s25  ;;  %s502_s25 = scalar_lea.vmem %s2130_s14, %s1420_s17 }
 0x35a   : > { %989 = vrot.lane.b32.xlu0 %v1993_v10, %s1771_s27 }
 0x36d   : > { %984 = vadd.xlane.f32.xlu1 %v983_v9  ;;  %v1630_v9 = vld [vmem:[#allocation3 + $0x8] sm:$0xff]  }
 0x37e   : > { %871 = vrot.lane.b32.xlu1 %v1993_v10, %s1772_s30 }
 0x3bd   : > { %v635_v11 = vpop.xlane.xlu0 %634 }
 0x3be   : > { %1643 = vrcp.f32 %v635_v11  ;;  %v1632_v11 = vld [vmem:[%s2126_s10 + $0x8] sm:$0xff]  }
 0x3c5   : > { %v749_v12 = vpop.xlane.xlu1 %748 }
 0x3c6   : > { %1645 = vrcp.f32 %v749_v12 }
 0x3c8   : > { %v1644_v13 = vpop.eup %1643 }
 0x3c9   : > { %v637_v15 = vmul.f32 %v1644_v13, %v1636_v58  ;;  %v754_v18 = vpop.permute.xlu1 %753 }
 0x3ca   : > { %v759_v21 = vsel %vm644_vm3, %v754_v18, 0  ;;  %v1439_v18 = vld [vmem:[%s2123_s7] ss:$0 sm:$0xff] }
 0x3cb   : > { %v638_v19 = vpack.c.bf16 %v637_v15, %v637_v15 }
 0x3cd   : > { %v867_v14 = vpop.xlane.xlu0 %866 }
 0x3ce   : > { %1647 = vrcp.f32 %v867_v14 }
 0x3d0   : > { %v1646_v20 = vpop.eup %1645 }
 0x3d1   : > { %v640_v16 = vpop.permute.xlu0 %639  ;;  %v751_v10 = vmul.f32 %v1646_v20, %v1638_v63 }
 0x3d2   : > { %v646_v17 = vsel %vm644_vm3, %v640_v16, 0  ;;  %v1438_v16 = vld [vmem:[%s2122_s6] ss:$0 sm:$0xff] }
 0x3d3   : > { %1499 = vmatpush3.bf16.msra.mxu0 %v646_v17  ;;  %v752_v22 = vpack.c.bf16 %v751_v10, %v751_v10  ;;  %v1633_v10 = vld [vmem:[%s2126_s10 + $0x10] sm:$0xff]  }
 0x3d4   : > { %1510 = vmatprep.subr.bf16.mxu0 %v1760_v0 }
 0x3d5   : > { %v990_v28 = vpop.permute.xlu0 %989 }
 0x3d6   : > { %1501 = vmatmul.mubr.msk.bf16.vlgmr.msra.gmra.mrb[4].mxu0 %vm578_vm2, %v638_v19  ;;  %v995_v30 = vsel %vm644_vm3, %v990_v28, 0 }
 0x3d7   : > { %1511 = vmatpush3.bf16.msra.mxu0 %v759_v21  ;;  %1512 = vmatprep.mubr.msk.bf16.mxu0 %vm1761_vm0, %v1760_v0 }
 0x3d8   : > { %1522 = vmatprep.subr.bf16.mxu0 %v1760_v0  ;;  %v1648_v23 = vpop.eup %1647 }
 0x3d9   : > { %v869_v25 = vmul.f32 %v1648_v23, %v1640_v2  ;;  %v1440_v23 = vld [vmem:[#allocation5] ss:$0 sm:$0xff] }
 0x3db   : > { %v870_v29 = vpack.c.bf16 %v869_v25, %v869_v25 }
 0x3de   : > { %1513 = vmatmul.mubr.msk.bf16.vlgmr.msra.gmra.mrb[8].mxu0 %vm578_vm2, %v752_v22  ;;  %v1634_v22 = vld [vmem:[%s2126_s10 + $0x18] sm:$0xff]  }
 0x3df   : > { %1524 = vmatprep.mubr.msk.bf16.mxu0 %vm1761_vm0, %v1760_v0 }
 0x3fa   : > { %v985_v24 = vpop.xlane.xlu1 %984 }
 0x3fb   : > { %1649 = vrcp.f32 %v985_v24 }
 0x3fe   : > { %v872_v26 = vpop.permute.xlu1 %871 }
 0x3ff   : > { %v877_v27 = vsel %vm644_vm3, %v872_v26, 0 }
 0x400   : > { %1523 = vmatpush3.bf16.msra.mxu0 %v877_v27 }
 0x401   : > { %1534 = vmatprep.subr.bf16.mxu0 %v1760_v0 }
 0x403   : > { %1525 = vmatmul.mubr.msk.bf16.vlgmr.msra.gmra.mrb[12].mxu0 %vm578_vm2, %v870_v29 }
 0x404   : > { %1535 = vmatpush3.bf16.msra.mxu0 %v995_v30  ;;  %1536 = vmatprep.mubr.msk.bf16.mxu0 %vm1761_vm0, %v1760_v0 }
 0x405   : > { %v1650_v31 = vpop.eup %1649  ;;  %1548 = vmatprep.subr.bf16.mxu0 %v1760_v0 }
 0x406   : > { %v987_v32 = vmul.f32 %v1650_v31, %v1642_v8  ;;  %v1629_v8 = vld [vmem:[#allocation3] sm:$0xff]   ;;  %v1444_v31 = vld [vmem:[#allocation7] ss:$0 sm:$0xff] }
 0x408   : > { %v988_v33 = vpack.c.bf16 %v987_v32, %v987_v32 }
 0x40b   : > { %1537 = vmatmul.mubr.msk.bf16.vlgmr.msra.gmra.mrb[16].mxu0 %vm578_vm2, %v988_v33 }
 0x40c   : > { %1552 = vmatprep.mubr.msk.bf16.mxu0 %vm1761_vm0, %v1760_v0  ;;  %1549 = vmatpush3.bf16.msra.mxu0 %v1629_v8 }
 0x40d   : > { %1550 = vmatprep.subr.bf16.mxu0 %v1760_v0 }
 0x410   : > { %1551 = vmatpush3.bf16.msra.mxu0 %v1630_v9 }
 0x4a9   : > { %v682_v34 = vpop.f32.mrb[4].mxu0 }
 0x4aa   : > { %688 = vst.msk [vmem:[#allocation2] sm:$0xff] %vm578_vm2, %v682_v34  ;;  %v1502_v35 = vpop.f32.mrb[5].mxu0 }
 0x4ab   : > { %v685_v36 = vpop.f32.mrb[6].mxu0 }
 0x4ac   : > { %v1503_v37 = vpop.f32.mrb[7].mxu0 }
 0x4b1   : > { %v795_v38 = vpop.f32.mrb[8].mxu0 }
 0x4b2   : > { %802 = vrot.lane.b32.xlu1 %v795_v38, %s1773_s18  ;;  %v1514_v39 = vpop.f32.mrb[9].mxu0 }
 0x4b3   : > { %v798_v40 = vpop.f32.mrb[10].mxu0 }
 0x4b4   : > { %v1515_v41 = vpop.f32.mrb[11].mxu0 }
 0x4d6   : > { %v913_v44 = vpop.f32.mrb[12].mxu0 }
 0x4d7   : > { %920 = vrot.lane.b32.xlu0 %v913_v44, %s1774_s29  ;;  %v1526_v45 = vpop.f32.mrb[13].mxu0 }
 0x4d8   : > { %v916_v46 = vpop.f32.mrb[14].mxu0 }
 0x4d9   : > { %v1527_v47 = vpop.f32.mrb[15].mxu0 }
 0x4da   : > { %v1450_v47 = vld [vmem:[%s2128_s12] ss:$0 sm:$0xff] }
 0x4de   : > { %v1031_v48 = vpop.f32.mrb[16].mxu0 }
 0x4df   : > { %1038 = vrot.lane.b32.xlu1 %v1031_v48, %s1775_s9  ;;  %v1538_v49 = vpop.f32.mrb[17].mxu0 }
 0x4e0   : > { %v1034_v50 = vpop.f32.mrb[18].mxu0  ;;  %v1451_v49 = vld [vmem:[%s2129_s13] ss:$0 sm:$0xff] }
 0x4e1   : > { %v1539_v51 = vpop.f32.mrb[19].mxu0 }
 0x524   : > { %v803_v52 = vpop.permute.xlu1 %802 }
 0x525   : > { %806 = vst.msk [vmem:[#allocation2] sm:$0xff] %vm805_vm4, %v803_v52 }
 0x549   : > { %v921_v53 = vpop.permute.xlu0 %920 }
 0x54a   : > { %924 = vst.msk [vmem:[#allocation2] sm:$0xff] %vm923_vm5, %v921_v53 }
 0x551   : > { %v1039_v54 = vpop.permute.xlu1 %1038 }
 0x552   : > { %1042 = vst.msk [vmem:[#allocation2] sm:$0xff] %vm1041_vm6, %v1039_v54 }
 0x559   : > { %v1043_v55 = vld [vmem:[#allocation2] sm:$0xff] }
 0x55a   : > { %v1044_v56 = vpack.c.bf16 %v1043_v55, %v1043_v55 }
 0x55c   : > { %1545 = vmatmul.mubr.msk.bf16.vlgmr.msra.gmra.mrb[16].mxu1 %vm530_vm1, %v1044_v56 }
 0x55d   : > { %1564 = vmatprep.mubr.msk.bf16.mxu1 %vm1761_vm0, %v1760_v0 }
 0x62f   : > { %v1105_v58 = vpop.f32.mrb[16].mxu1 }
 0x630   : > { %v1106_v59 = vadd.f32 %v1434_v57, %v1105_v58  ;;  %v1546_v60 = vpop.f32.mrb[17].mxu1 }
 0x631   : > { %v1108_v61 = vpop.f32.mrb[18].mxu1 }
 0x632   : > { %v1547_v62 = vpop.f32.mrb[19].mxu1  ;;  %v1111_v63 = vadd.f32 %v1106_v59, %v1981_v3  ;;  %v1631_v3 = vld [vmem:[%s2126_s10] sm:$0xff]  }
 0x633   : > { %1557 = vmatpush3.bf16.msra.mxu1 %v1631_v3 }
 0x634   : > { %v1114_v1 = vsel %vm530_vm1, %v1111_v63, 0.0  ;;  %1558 = vmatprep.subr.bf16.mxu1 %v1760_v0 }
 0x635   : > { %1115 = vadd.xlane.f32.xlu0 %v1114_v1 }
 0x637   : > { %1559 = vmatpush3.bf16.msra.mxu1 %v1632_v11 }
 0x638   : > { %1560 = vmatprep.subr.bf16.mxu1 %v1760_v0 }
 0x63b   : > { %1561 = vmatpush3.bf16.msra.mxu1 %v1633_v10 }
 0x63c   : > { %1562 = vmatprep.subr.bf16.mxu1 %v1760_v0 }
 0x63f   : > { %1563 = vmatpush3.bf16.msra.mxu1 %v1634_v22 }
 0x6c2   : > { %v1116_v2 = vpop.xlane.xlu0 %1115 }
 0x6c3   : > { %v1118_v4 = vmul.f32 0.03125, %v1116_v2 }
 0x6c5   : > { %v1119_v5 = vsub.f32 %v1111_v63, %v1118_v4 }
 0x6c7   : > { %v1120_v6 = vmul.f32 %v1119_v5, %v1119_v5 }
 0x6c9   : > { %v1121_v7 = vsel %vm530_vm1, %v1120_v6, 0.0 }
 0x6ca   : > { %1122 = vadd.xlane.f32.xlu1 %v1121_v7 }
 0x757   : > { %v1123_v12 = vpop.xlane.xlu1 %1122 }
 0x758   : > { %v1124_v13 = vmul.f32 0.03125, %v1123_v12 }
 0x75a   : > { %v1125_v14 = vadd.f32 1e-05, %v1124_v13 }
 0x75c   : > { %1651 = vrsqrt.f32 %v1125_v14 }
 0x766   : > { %v1652_v15 = vpop.eup %1651 }
 0x767   : > { %v1127_v17 = vmul.f32 %v1652_v15, %v1119_v5 }
 0x769   : > { %v1134_v19 = vmul.f32 %v1438_v16, %v1127_v17 }
 0x76b   : > { %v1141_v20 = vadd.f32 %v1439_v18, %v1134_v19 }
 0x76d   : > { %v1142_v21 = vpack.c.bf16 %v1141_v20, %v1141_v20 }
 0x76f   : > { %1553 = vmatmul.mubr.msk.bf16.vlgmr.msra.gmra.mrb[20].mxu0 %vm530_vm1, %v1142_v21 }
 0x842   : > { %v1203_v24 = vpop.f32.mrb[20].mxu0 }
 0x843   : > { %v1204_v25 = vadd.f32 %v1440_v23, %v1203_v24  ;;  %v1554_v26 = vpop.f32.mrb[21].mxu0 }
 0x844   : > { %v1206_v27 = vpop.f32.mrb[22].mxu0 }
 0x845   : > { %v1209_v28 = vmax.f32 %v1204_v25, 0.0  ;;  %v1555_v29 = vpop.f32.mrb[23].mxu0 }
 0x847   : > { %v1210_v30 = vpack.c.bf16 %v1209_v28, %v1209_v28 }
 0x849   : > { %1565 = vmatmul.mubr.msk.bf16.vlgmr.msra.gmra.mrb[20].mxu1 %vm1250_vm7, %v1210_v30 }
 0x91c   : > { %v1288_v32 = vpop.f32.mrb[20].mxu1 }
 0x91d   : > { %v1289_v33 = vadd.f32 %v1444_v31, %v1288_v32  ;;  %v1566_v34 = vpop.f32.mrb[21].mxu1 }
 0x91e   : > { %v1291_v0 = vpop.f32.mrb[22].mxu1 }
 0x91f   : > { %v1567_v35 = vpop.f32.mrb[23].mxu1  ;;  %v1294_v36 = vadd.f32 %v1289_v33, %v1141_v20 }
 0x921   : > { %v1297_v37 = vsel %vm530_vm1, %v1294_v36, 0.0 }
 0x922   : > { %1298 = vadd.xlane.f32.xlu0 %v1297_v37 }
 0x9af   : > { %v1299_v38 = vpop.xlane.xlu0 %1298 }
 0x9b0   : > { %v1300_v39 = vmul.f32 0.03125, %v1299_v38 }
 0x9b2   : > { %v1301_v40 = vsub.f32 %v1294_v36, %v1300_v39 }
 0x9b4   : > { %v1302_v41 = vmul.f32 %v1301_v40, %v1301_v40 }
 0x9b6   : > { %v1303_v42 = vsel %vm530_vm1, %v1302_v41, 0.0 }
 0x9b7   : > { %1304 = vadd.xlane.f32.xlu0 %v1303_v42 }
 0xa44   : > { %v1305_v43 = vpop.xlane.xlu0 %1304 }
 0xa45   : > { %v1306_v44 = vmul.f32 0.03125, %v1305_v43 }
 0xa47   : > { %v1307_v45 = vadd.f32 1e-05, %v1306_v44 }
 0xa49   : > { %1653 = vrsqrt.f32 %v1307_v45 }
 0xa53   : > { %v1654_v46 = vpop.eup %1653 }
 0xa54   : > { %v1309_v48 = vmul.f32 %v1654_v46, %v1301_v40 }
 0xa56   : > { %v1316_v50 = vmul.f32 %v1450_v47, %v1309_v48 }
 0xa58   : > { %v1323_v51 = vadd.f32 %v1451_v49, %v1316_v50 }
 0xa5a   : > { %1324 = vst.msk [vmem:[%s502_s25] sm:$0xff] %vm530_vm1, %v1323_v51 }
 0xa5b PF: > { %s2145_s27 = sld [smem:[#allocation10_spill]] }
 0xa61   : > { %s26_s29 = sadd.s32 1, %s2145_s27  }
 0xa62   : > { %p23_p5 = scmp.ge.s32.totalorder %s26_s29, 4  }
 0xa64   :  { %25 = sbr.rel (!%p23_p5) target bundleno = 4 (0x4), region = 119 }
 0xa6b   :  { %1344 = vsyncpa [#allocation4], 1 }
 0xa6c   :  { %1346 = vsyncpa [#allocation4 + $0x1], 1 }
 0xa6d   :  { %1347 = vsyncpa [#allocation6], 1 }

</bundles_post_ra>
